<compile_context>
chip_gen: v5e
topology: v5e:2x2
jax: 0.10.0
libtpu: 0.0.40
codegen_flags: <defaults>
</compile_context>

<pallas_src>
import functools

import numpy as np
import jax
import jax.numpy as jnp
from jax.experimental import pallas as pl
from jax.experimental.pallas import tpu as pltpu


# --------------------------------------------------------------------------- #
# Geometry helpers (all plain-Python / static)
# --------------------------------------------------------------------------- #

def _round_up(x, m):
    return ((x + m - 1) // m) * m


def _geometry(h, w):
    """Lane-aligned padded row-flattened layout for a 3x3/pad=1 conv.

    Returns (t, d, lcore, blk, offsets, mask) where
      t      : number of zero rows padded on top (so the core start is lane-aligned)
      d      : lane offset where the conv core starts (multiple of 128, >= wp+1)
      lcore  : core length (multiple of 128) covering every real pixel position
      blk    : per-image block length (multiple of 128), all conv reads stay inside
      offsets: the 9 constant lane offsets of a 3x3 conv
      mask   : (1, lcore) f32, 1.0 at real-pixel positions of the core
    """
    wp = w + 2                                     # padded row width (1 col left/right)
    d = _round_up(wp + 1, 128)                     # aligned core start, >= max |offset|
    t = -(-(d - 1) // wp)                          # top pad rows so first real pos >= d
    first_real = t * wp + 1
    last_real = (t + h - 1) * wp + w
    assert first_real >= d
    lcore = _round_up(last_real - d + 1, 128)
    data_len = (t + h + 1) * wp                    # top pad + image + 1 bottom pad row
    blk = _round_up(max(data_len, d + lcore + wp + 1), 128)
    offsets = tuple((dy - 1) * wp + (dx - 1) for dy in range(3) for dx in range(3))

    mask = np.zeros((1, lcore), np.float32)
    for l in range(lcore):
        r, c = divmod(d + l, wp)
        if t <= r <= t + h - 1 and 1 <= c <= w:
            mask[0, l] = 1.0
    return t, d, lcore, blk, offsets, mask


def _grid_split(batch):
    """>=2 parallel grid steps when possible (v7x megacore), images grouped per step."""
    if batch >= 2 and batch % 2 == 0:
        return 2, batch // 2
    return batch, 1


def _to_cr_layout(x_nchw, t, blk):
    """NCHW f32 -> zero padded, per-image row-flattened bf16 'CR' layout (C, B*BLK)."""
    b, c, h, w = x_nchw.shape
    xp = jnp.pad(x_nchw, ((0, 0), (0, 0), (t, 1), (1, 1)))
    xp = xp.reshape(b, c, (t + h + 1) * (w + 2))
    xp = jnp.pad(xp, ((0, 0), (0, 0), (0, blk - xp.shape[-1])))
    return jnp.transpose(xp, (1, 0, 2)).reshape(c, b * blk).astype(jnp.bfloat16)


def _full_spec(shape):
    n = len(shape)
    return pl.BlockSpec(shape, lambda s, _n=n: (0,) * _n)


# --------------------------------------------------------------------------- #
# Fused kernel: classifier(x), denoiser(x), classifier(denoiser(x)) per grid step
# --------------------------------------------------------------------------- #

def _denoise_net_kernel(x_ref, mask_ref, w1c_ref, b1c_ref, fwt_ref, fb_ref,
                        w2_ref, b2_ref, logits_ref, hpad_ref, dpad_ref,
                        *, d, lcore, blk, offsets, hid, n_img, nc, inv_hw):
    mask = mask_ref[...]                                       # (1, n_img*lcore) f32
    zr_w = blk - d - lcore                                     # right pad width (aligned)

    def im2col(src_ref):
        # One (9*rows, n_img*lcore) bf16 GEMM operand built from 9 statically shifted
        # lane slices of each image's zero-padded block (single MXU push per conv).
        def one(i):
            return jnp.concatenate(
                [src_ref[:, i * blk + d + o:i * blk + d + o + lcore] for o in offsets],
                axis=0)
        return jnp.concatenate([one(i) for i in range(n_img)], axis=1)

    def pad_cores(core_vals, rows, dst_ref):
        # Re-embed per-image (rows, lcore) cores into zero-padded (rows, blk) blocks.
        # d / lcore / blk are 128-aligned -> full unmasked stores.
        zl = jnp.zeros((rows, d), jnp.bfloat16)
        zr = jnp.zeros((rows, zr_w), jnp.bfloat16)
        for i, v in enumerate(core_vals):
            dst_ref[:, i * blk:(i + 1) * blk] = jnp.concatenate([zl, v, zr], axis=1)

    def gap(act):
        # Per-image masked global average pool (lane reduction on the XLU).
        return [jnp.sum(act[:, i * lcore:(i + 1) * lcore], axis=1, keepdims=True)
                for i in range(n_img)]

    # --- shared first conv: rows [0:hid] classifier, rows [hid:2*hid] denoiser -----------
    acc1 = jnp.dot(w1c_ref[...], im2col(x_ref), preferred_element_type=jnp.float32)
    h = jnp.maximum(acc1 + b1c_ref[...], 0.0) * mask           # (2*hid, n_img*lcore) f32

    # --- classifier GAP on the original images --------------------------------------------
    pool_cls = gap(h[:hid, :])

    # --- denoiser conv2 (+ residual); hidden activation / denoised image stay in VMEM -----
    pad_cores([h[hid:, i * lcore:(i + 1) * lcore].astype(jnp.bfloat16)
               for i in range(n_img)], hid, hpad_ref)
    acc2 = jnp.dot(w2_ref[...], im2col(hpad_ref), preferred_element_type=jnp.float32)
    den = (acc2 + b2_ref[...]) * mask                          # (cin, n_img*lcore) f32
    pad_cores([(den[:, i * lcore:(i + 1) * lcore]
                + x_ref[:, i * blk + d:i * blk + d + lcore].astype(jnp.float32)
                ).astype(jnp.bfloat16) for i in range(n_img)],
              dpad_ref.shape[0], dpad_ref)

    # --- second classifier pass on the denoised image (same pallas_call) -------------------
    acc3 = jnp.dot(w1c_ref[:hid, :], im2col(dpad_ref), preferred_element_type=jnp.float32)
    hden = jnp.maximum(acc3 + b1c_ref[:hid, :], 0.0) * mask    # (hid, n_img*lcore) f32

    # --- both classifier heads (orig + denoised images) in one tiny GEMM -------------------
    pooled = jnp.concatenate(pool_cls + gap(hden), axis=1) * inv_hw   # (hid, 2*n_img) f32
    logits = jnp.dot(fwt_ref[...], pooled.astype(jnp.bfloat16),
                     preferred_element_type=jnp.float32) + fb_ref[...]  # (nc, 2*n_img)
    logits_ref[...] = logits.reshape(1, nc, 2 * n_img)


def _run_fused(x_cr, mask_t, packed, *, batch, n_steps, n_img, blk, d, lcore,
               offsets, hw, cin, hid, nc):
    kern = functools.partial(
        _denoise_net_kernel, d=d, lcore=lcore, blk=blk, offsets=offsets,
        hid=hid, n_img=n_img, nc=nc, inv_hw=1.0 / hw)
    logits = pl.pallas_call(
        kern,
        out_shape=jax.ShapeDtypeStruct((n_steps, nc, 2 * n_img), jnp.float32),
        grid=(n_steps,),
        in_specs=[
            pl.BlockSpec((cin, n_img * blk), lambda s: (0, s)),
            _full_spec(mask_t.shape),
            _full_spec(packed["w1c"].shape),
            _full_spec(packed["b1c"].shape),
            _full_spec(packed["fwt"].shape),
            _full_spec(packed["fb"].shape),
            _full_spec(packed["w2"].shape),
            _full_spec(packed["b2"].shape),
        ],
        out_specs=pl.BlockSpec((1, nc, 2 * n_img), lambda s: (s, 0, 0)),
        scratch_shapes=[
            pltpu.VMEM((hid, n_img * blk), jnp.bfloat16),   # padded hidden activation
            pltpu.VMEM((cin, n_img * blk), jnp.bfloat16),   # padded denoised image
        ],
        compiler_params=pltpu.CompilerParams(dimension_semantics=("parallel",)),
    )(x_cr, mask_t, packed["w1c"], packed["b1c"], packed["fwt"], packed["fb"],
      packed["w2"], packed["b2"])
    # lanes [0:n_img] = classifier(x), lanes [n_img:2*n_img] = classifier(denoiser(x))
    cls = jnp.transpose(logits[:, :, :n_img], (0, 2, 1)).reshape(batch, nc)
    den = jnp.transpose(logits[:, :, n_img:], (0, 2, 1)).reshape(batch, nc)
    return cls, den


# --------------------------------------------------------------------------- #
# Parameters / packing
# --------------------------------------------------------------------------- #

def init_params(key, cin=4, hidden=8, num_classes=10):
    ks = jax.random.split(key, 8)
    s = 0.1
    return {
        # classifier
        "cw1": s * jax.random.normal(ks[0], (3, 3, cin, hidden), jnp.float32),
        "cb1": s * jax.random.normal(ks[1], (1, hidden), jnp.float32),
        "fw": s * jax.random.normal(ks[2], (hidden, num_classes), jnp.float32),
        "fb": s * jax.random.normal(ks[3], (1, num_classes), jnp.float32),
        # denoiser
        "dw1": s * jax.random.normal(ks[4], (3, 3, cin, hidden), jnp.float32),
        "db1": s * jax.random.normal(ks[5], (1, hidden), jnp.float32),
        "dw2": s * jax.random.normal(ks[6], (3, 3, hidden, cin), jnp.float32),
        "db2": s * jax.random.normal(ks[7], (1, cin), jnp.float32),
    }


def _pack_params(p):
    """Pre-pack weights once: im2col-flattened (Cout, 9*Cin) bf16 conv weights, f32 biases."""
    def conv_im2col(w):                               # (3,3,Cin,Cout) -> (Cout, 9*Cin) bf16
        kh, kw, ci, co = w.shape
        return (w.reshape(kh * kw, ci, co).transpose(2, 0, 1)
                .reshape(co, kh * kw * ci).astype(jnp.bfloat16))

    def col(b):                                       # (1,C) -> (C,1) f32
        return jnp.reshape(b, (-1, 1)).astype(jnp.float32)

    return {
        "w1c": conv_im2col(jnp.concatenate([p["cw1"], p["dw1"]], axis=-1)),  # (2*hid, 9*cin)
        "b1c": col(jnp.concatenate([p["cb1"], p["db1"]], axis=-1)),          # (2*hid, 1)
        "fwt": jnp.transpose(p["fw"]).astype(jnp.bfloat16),                  # (nc, hid)
        "fb": col(p["fb"]),                                                  # (nc, 1)
        "w2": conv_im2col(p["dw2"]),                                         # (cin, 9*hid)
        "b2": col(p["db2"]),                                                 # (cin, 1)
    }


# --------------------------------------------------------------------------- #
# Full pipeline (jitted): classifier(x) and classifier(denoiser(x)) logits.
# --------------------------------------------------------------------------- #

def _denoise_pipeline(packed, x_nchw):
    b, cin, h, w = x_nchw.shape
    t, d, lcore, blk, offsets, mask_np = _geometry(h, w)
    n_steps, n_img = _grid_split(b)
    mask_t = jnp.asarray(np.tile(mask_np, (1, n_img)))        # (1, n_img*lcore)
    x_cr = _to_cr_layout(x_nchw, t, blk)
    hid = packed["w1c"].shape[0] // 2
    nc = packed["fwt"].shape[0]
    return _run_fused(x_cr, mask_t, packed, batch=b, n_steps=n_steps, n_img=n_img,
                      blk=blk, d=d, lcore=lcore, offsets=offsets, hw=h * w,
                      cin=cin, hid=hid, nc=nc)


_denoise_pipeline_jit = jax.jit(_denoise_pipeline)


# --------------------------------------------------------------------------- #
# DenoiseNet
# --------------------------------------------------------------------------- #

class DenoiseNetPallas:
    """Pallas re-implementation of models/DenoiseNet.DenoiseNet.forward."""

    def __init__(self, params):
        self.p = params
        self._packed = _pack_params(params)

    def loss(self, a, b):
        # Tiny (B, num_classes) reduction: plain JAX (a dedicated kernel is pure overhead).
        return jnp.mean(jnp.abs(a - b))

    def _pipeline(self, x_nchw):
        return _denoise_pipeline_jit(self._packed, x_nchw)

    def forward(self, orig_x, adv_x=None, requires_control=True, eval_mode=False):
        if adv_x is None:
            _orig_out, denoised_orig_out = self._pipeline(orig_x)
            return denoised_orig_out

        nb = orig_x.shape[0]
        stacked = jnp.concatenate([orig_x, adv_x], axis=0)     # batch orig+adv together
        cls_out, den_out = self._pipeline(stacked)
        orig_out, adv_out = cls_out[:nb], cls_out[nb:]
        denoised_orig_out, denoised_adv_out = den_out[:nb], den_out[nb:]

        if requires_control:
            control_loss = self.loss(adv_out, orig_out)
        loss = self.loss(denoised_adv_out, orig_out)
        if eval_mode:
            return (orig_out, denoised_orig_out, adv_out, denoised_adv_out)
        elif not requires_control:
            return (orig_out, denoised_adv_out, loss)
        else:
            return (orig_out, denoised_adv_out, loss, control_loss)


if __name__ == "__main__":
    key = jax.random.PRNGKey(0)
    k_orig, k_adv, k_params = jax.random.split(key, 3)

    # Small shapes consistent with the forward: batch=2, channels=4, spatial=16.
    orig_x = jax.random.normal(k_orig, (2, 4, 16, 16), jnp.float32)
    adv_x = orig_x + 0.1 * jax.random.normal(k_adv, (2, 4, 16, 16), jnp.float32)

    params = init_params(k_params)
    net = DenoiseNetPallas(params)

    # Adversarial branch with control loss -> (orig_out, denoised_adv_out, loss, control_loss)
    out_adv = net.forward(orig_x, adv_x, requires_control=True, eval_mode=False)
    jax.block_until_ready(out_adv)
    assert out_adv[0].shape == (2, 10) and out_adv[1].shape == (2, 10)
    assert out_adv[2].shape == () and out_adv[3].shape == ()

    # Eval mode -> (orig_out, denoised_orig_out, adv_out, denoised_adv_out)
    out_eval = net.forward(orig_x, adv_x, requires_control=True, eval_mode=True)
    jax.block_until_ready(out_eval)
    assert all(o.shape == (2, 10) for o in out_eval)

    # Clean branch -> denoised_orig_out
    out_clean = net.forward(orig_x)
    jax.block_until_ready(out_clean)
    assert out_clean.shape == (2, 10)

    print("KERNEL_OK")
</pallas_src>

<mosaic_0001>
module attributes {stable_mosaic.version = 11 : i64} {
  func.func @_denoise_net_kernel(%arg0: i32, %arg1: memref<4x1280xbf16, #tpu.memory_space<vmem>>, %arg2: memref<1x768xf32, #tpu.memory_space<vmem>>, %arg3: memref<16x36xbf16, #tpu.memory_space<vmem>>, %arg4: memref<16x1xf32, #tpu.memory_space<vmem>>, %arg5: memref<10x8xbf16, #tpu.memory_space<vmem>>, %arg6: memref<10x1xf32, #tpu.memory_space<vmem>>, %arg7: memref<4x72xbf16, #tpu.memory_space<vmem>>, %arg8: memref<4x1xf32, #tpu.memory_space<vmem>>, %arg9: memref<1x10x4xf32, #tpu.memory_space<vmem>>, %arg10: memref<8x1280xbf16, #tpu.memory_space<vmem>>, %arg11: memref<4x1280xbf16, #tpu.memory_space<vmem>>) attributes {dimension_semantics = [#tpu.dimension_semantics<parallel>], iteration_bounds = array<i64: 2>, scalar_prefetch = 0 : i64, scratch_operands = 2 : i64, tpu.core_type = #tpu.core_type<tc>, window_params = [{transform_indices = @transform_0, window_bounds = array<i64: 4, 1280>}, {pipeline_mode = #tpu.pipeline_mode<synchronous>, transform_indices = @transform_1, window_bounds = array<i64: 1, 768>}, {pipeline_mode = #tpu.pipeline_mode<synchronous>, transform_indices = @transform_2, window_bounds = array<i64: 16, 36>}, {pipeline_mode = #tpu.pipeline_mode<synchronous>, transform_indices = @transform_3, window_bounds = array<i64: 16, 1>}, {pipeline_mode = #tpu.pipeline_mode<synchronous>, transform_indices = @transform_4, window_bounds = array<i64: 10, 8>}, {pipeline_mode = #tpu.pipeline_mode<synchronous>, transform_indices = @transform_5, window_bounds = array<i64: 10, 1>}, {pipeline_mode = #tpu.pipeline_mode<synchronous>, transform_indices = @transform_6, window_bounds = array<i64: 4, 72>}, {pipeline_mode = #tpu.pipeline_mode<synchronous>, transform_indices = @transform_7, window_bounds = array<i64: 4, 1>}, {transform_indices = @transform_8, window_bounds = array<i64: 1, 10, 4>}]} {
    %c0 = arith.constant 0 : index
    %c0_0 = arith.constant 0 : index
    %0 = vector.load %arg2[%c0, %c0_0] : memref<1x768xf32, #tpu.memory_space<vmem>>, vector<1x768xf32>
    %c0_1 = arith.constant 0 : index
    %c0_2 = arith.constant 0 : index
    %1 = vector.load %arg3[%c0_1, %c0_2] : memref<16x36xbf16, #tpu.memory_space<vmem>>, vector<16x36xbf16>
    %c0_3 = arith.constant 0 : index
    %c109 = arith.constant 109 : index
    %2 = vector.load %arg1[%c0_3, %c109] : memref<4x1280xbf16, #tpu.memory_space<vmem>>, vector<4x384xbf16>
    %c0_4 = arith.constant 0 : index
    %c110 = arith.constant 110 : index
    %3 = vector.load %arg1[%c0_4, %c110] : memref<4x1280xbf16, #tpu.memory_space<vmem>>, vector<4x384xbf16>
    %c0_5 = arith.constant 0 : index
    %c111 = arith.constant 111 : index
    %4 = vector.load %arg1[%c0_5, %c111] : memref<4x1280xbf16, #tpu.memory_space<vmem>>, vector<4x384xbf16>
    %c0_6 = arith.constant 0 : index
    %c127 = arith.constant 127 : index
    %5 = vector.load %arg1[%c0_6, %c127] : memref<4x1280xbf16, #tpu.memory_space<vmem>>, vector<4x384xbf16>
    %c0_7 = arith.constant 0 : index
    %c128 = arith.constant 128 : index
    %6 = vector.load %arg1[%c0_7, %c128] : memref<4x1280xbf16, #tpu.memory_space<vmem>>, vector<4x384xbf16>
    %c0_8 = arith.constant 0 : index
    %c129 = arith.constant 129 : index
    %7 = vector.load %arg1[%c0_8, %c129] : memref<4x1280xbf16, #tpu.memory_space<vmem>>, vector<4x384xbf16>
    %c0_9 = arith.constant 0 : index
    %c145 = arith.constant 145 : index
    %8 = vector.load %arg1[%c0_9, %c145] : memref<4x1280xbf16, #tpu.memory_space<vmem>>, vector<4x384xbf16>
    %c0_10 = arith.constant 0 : index
    %c146 = arith.constant 146 : index
    %9 = vector.load %arg1[%c0_10, %c146] : memref<4x1280xbf16, #tpu.memory_space<vmem>>, vector<4x384xbf16>
    %c0_11 = arith.constant 0 : index
    %c147 = arith.constant 147 : index
    %10 = vector.load %arg1[%c0_11, %c147] : memref<4x1280xbf16, #tpu.memory_space<vmem>>, vector<4x384xbf16>
    %11 = tpu.concatenate %2, %3, %4, %5, %6, %7, %8, %9, %10 in 0 : vector<4x384xbf16>, vector<4x384xbf16>, vector<4x384xbf16>, vector<4x384xbf16>, vector<4x384xbf16>, vector<4x384xbf16>, vector<4x384xbf16>, vector<4x384xbf16>, vector<4x384xbf16> -> vector<36x384xbf16>
    %c0_12 = arith.constant 0 : index
    %c749 = arith.constant 749 : index
    %12 = vector.load %arg1[%c0_12, %c749] : memref<4x1280xbf16, #tpu.memory_space<vmem>>, vector<4x384xbf16>
    %c0_13 = arith.constant 0 : index
    %c750 = arith.constant 750 : index
    %13 = vector.load %arg1[%c0_13, %c750] : memref<4x1280xbf16, #tpu.memory_space<vmem>>, vector<4x384xbf16>
    %c0_14 = arith.constant 0 : index
    %c751 = arith.constant 751 : index
    %14 = vector.load %arg1[%c0_14, %c751] : memref<4x1280xbf16, #tpu.memory_space<vmem>>, vector<4x384xbf16>
    %c0_15 = arith.constant 0 : index
    %c767 = arith.constant 767 : index
    %15 = vector.load %arg1[%c0_15, %c767] : memref<4x1280xbf16, #tpu.memory_space<vmem>>, vector<4x384xbf16>
    %c0_16 = arith.constant 0 : index
    %c768 = arith.constant 768 : index
    %16 = vector.load %arg1[%c0_16, %c768] : memref<4x1280xbf16, #tpu.memory_space<vmem>>, vector<4x384xbf16>
    %c0_17 = arith.constant 0 : index
    %c769 = arith.constant 769 : index
    %17 = vector.load %arg1[%c0_17, %c769] : memref<4x1280xbf16, #tpu.memory_space<vmem>>, vector<4x384xbf16>
    %c0_18 = arith.constant 0 : index
    %c785 = arith.constant 785 : index
    %18 = vector.load %arg1[%c0_18, %c785] : memref<4x1280xbf16, #tpu.memory_space<vmem>>, vector<4x384xbf16>
    %c0_19 = arith.constant 0 : index
    %c786 = arith.constant 786 : index
    %19 = vector.load %arg1[%c0_19, %c786] : memref<4x1280xbf16, #tpu.memory_space<vmem>>, vector<4x384xbf16>
    %c0_20 = arith.constant 0 : index
    %c787 = arith.constant 787 : index
    %20 = vector.load %arg1[%c0_20, %c787] : memref<4x1280xbf16, #tpu.memory_space<vmem>>, vector<4x384xbf16>
    %21 = tpu.concatenate %12, %13, %14, %15, %16, %17, %18, %19, %20 in 0 : vector<4x384xbf16>, vector<4x384xbf16>, vector<4x384xbf16>, vector<4x384xbf16>, vector<4x384xbf16>, vector<4x384xbf16>, vector<4x384xbf16>, vector<4x384xbf16>, vector<4x384xbf16> -> vector<36x384xbf16>
    %22 = tpu.concatenate %11, %21 in 1 : vector<36x384xbf16>, vector<36x384xbf16> -> vector<36x768xbf16>
    %cst = arith.constant dense<0.000000e+00> : vector<16x768xf32>
    %23 = tpu.matmul %1, %22, %cst {dimension_numbers = #tpu.dot_dimension_numbers<[1], [0], [0], [1], [0, 0, 1, 1], [], []>} : vector<16x36xbf16>, vector<36x768xbf16>, vector<16x768xf32> -> vector<16x768xf32>
    %c0_21 = arith.constant 0 : index
    %c0_22 = arith.constant 0 : index
    %24 = vector.load %arg4[%c0_21, %c0_22] : memref<16x1xf32, #tpu.memory_space<vmem>>, vector<16x1xf32>
    %25 = vector.broadcast %24 : vector<16x1xf32> to vector<16x768xf32>
    %26 = arith.addf %23, %25 : vector<16x768xf32>
    %cst_23 = arith.constant 0.000000e+00 : f32
    %27 = vector.broadcast %cst_23 : f32 to vector<16x768xf32>
    %28 = arith.maximumf %26, %27 : vector<16x768xf32>
    %29 = vector.broadcast %0 : vector<1x768xf32> to vector<16x768xf32>
    %30 = arith.mulf %28, %29 : vector<16x768xf32>
    %31 = vector.extract_strided_slice %30 {offsets = [0, 0], sizes = [8, 768], strides = [1, 1]} : vector<16x768xf32> to vector<8x768xf32>
    %32 = vector.extract_strided_slice %31 {offsets = [0, 0], sizes = [8, 384], strides = [1, 1]} : vector<8x768xf32> to vector<8x384xf32>
    %cst_24 = arith.constant dense<0.000000e+00> : vector<8xf32>
    %33 = vector.multi_reduction <add>, %32, %cst_24 [1] : vector<8x384xf32> to vector<8xf32>
    %34 = vector.shape_cast %33 : vector<8xf32> to vector<8x1xf32>
    %35 = vector.extract_strided_slice %31 {offsets = [0, 384], sizes = [8, 384], strides = [1, 1]} : vector<8x768xf32> to vector<8x384xf32>
    %cst_25 = arith.constant dense<0.000000e+00> : vector<8xf32>
    %36 = vector.multi_reduction <add>, %35, %cst_25 [1] : vector<8x384xf32> to vector<8xf32>
    %37 = vector.shape_cast %36 : vector<8xf32> to vector<8x1xf32>
    %38 = vector.extract_strided_slice %30 {offsets = [8, 0], sizes = [8, 384], strides = [1, 1]} : vector<16x768xf32> to vector<8x384xf32>
    %39 = arith.truncf %38 : vector<8x384xf32> to vector<8x384xbf16>
    %40 = vector.extract_strided_slice %30 {offsets = [8, 384], sizes = [8, 384], strides = [1, 1]} : vector<16x768xf32> to vector<8x384xf32>
    %41 = arith.truncf %40 : vector<8x384xf32> to vector<8x384xbf16>
    %cst_26 = arith.constant 0.000000e+00 : bf16
    %42 = vector.broadcast %cst_26 : bf16 to vector<8x128xbf16>
    %cst_27 = arith.constant 0.000000e+00 : bf16
    %43 = vector.broadcast %cst_27 : bf16 to vector<8x128xbf16>
    %44 = tpu.concatenate %42, %39, %43 in 1 : vector<8x128xbf16>, vector<8x384xbf16>, vector<8x128xbf16> -> vector<8x640xbf16>
    %c0_28 = arith.constant 0 : index
    %c0_29 = arith.constant 0 : index
    %45 = vector.load %arg10[%c0_28, %c0_29] : memref<8x1280xbf16, #tpu.memory_space<vmem>>, vector<8x640xbf16>
    tpu.vector_store %arg10[%c0_28, %c0_29], %44 {strides = array<i32>} : memref<8x1280xbf16, #tpu.memory_space<vmem>>, vector<8x640xbf16>,
    %46 = tpu.concatenate %42, %41, %43 in 1 : vector<8x128xbf16>, vector<8x384xbf16>, vector<8x128xbf16> -> vector<8x640xbf16>
    %c0_30 = arith.constant 0 : index
    %c640 = arith.constant 640 : index
    %47 = vector.load %arg10[%c0_30, %c640] : memref<8x1280xbf16, #tpu.memory_space<vmem>>, vector<8x640xbf16>
    tpu.vector_store %arg10[%c0_30, %c640], %46 {strides = array<i32>} : memref<8x1280xbf16, #tpu.memory_space<vmem>>, vector<8x640xbf16>,
    %c0_31 = arith.constant 0 : index
    %c0_32 = arith.constant 0 : index
    %48 = vector.load %arg7[%c0_31, %c0_32] : memref<4x72xbf16, #tpu.memory_space<vmem>>, vector<4x72xbf16>
    %c0_33 = arith.constant 0 : index
    %c109_34 = arith.constant 109 : index
    %49 = vector.load %arg10[%c0_33, %c109_34] : memref<8x1280xbf16, #tpu.memory_space<vmem>>, vector<8x384xbf16>
    %c0_35 = arith.constant 0 : index
    %c110_36 = arith.constant 110 : index
    %50 = vector.load %arg10[%c0_35, %c110_36] : memref<8x1280xbf16, #tpu.memory_space<vmem>>, vector<8x384xbf16>
    %c0_37 = arith.constant 0 : index
    %c111_38 = arith.constant 111 : index
    %51 = vector.load %arg10[%c0_37, %c111_38] : memref<8x1280xbf16, #tpu.memory_space<vmem>>, vector<8x384xbf16>
    %c0_39 = arith.constant 0 : index
    %c127_40 = arith.constant 127 : index
    %52 = vector.load %arg10[%c0_39, %c127_40] : memref<8x1280xbf16, #tpu.memory_space<vmem>>, vector<8x384xbf16>
    %c0_41 = arith.constant 0 : index
    %c128_42 = arith.constant 128 : index
    %53 = vector.load %arg10[%c0_41, %c128_42] : memref<8x1280xbf16, #tpu.memory_space<vmem>>, vector<8x384xbf16>
    %c0_43 = arith.constant 0 : index
    %c129_44 = arith.constant 129 : index
    %54 = vector.load %arg10[%c0_43, %c129_44] : memref<8x1280xbf16, #tpu.memory_space<vmem>>, vector<8x384xbf16>
    %c0_45 = arith.constant 0 : index
    %c145_46 = arith.constant 145 : index
    %55 = vector.load %arg10[%c0_45, %c145_46] : memref<8x1280xbf16, #tpu.memory_space<vmem>>, vector<8x384xbf16>
    %c0_47 = arith.constant 0 : index
    %c146_48 = arith.constant 146 : index
    %56 = vector.load %arg10[%c0_47, %c146_48] : memref<8x1280xbf16, #tpu.memory_space<vmem>>, vector<8x384xbf16>
    %c0_49 = arith.constant 0 : index
    %c147_50 = arith.constant 147 : index
    %57 = vector.load %arg10[%c0_49, %c147_50] : memref<8x1280xbf16, #tpu.memory_space<vmem>>, vector<8x384xbf16>
    %58 = tpu.concatenate %49, %50, %51, %52, %53, %54, %55, %56, %57 in 0 : vector<8x384xbf16>, vector<8x384xbf16>, vector<8x384xbf16>, vector<8x384xbf16>, vector<8x384xbf16>, vector<8x384xbf16>, vector<8x384xbf16>, vector<8x384xbf16>, vector<8x384xbf16> -> vector<72x384xbf16>
    %c0_51 = arith.constant 0 : index
    %c749_52 = arith.constant 749 : index
    %59 = vector.load %arg10[%c0_51, %c749_52] : memref<8x1280xbf16, #tpu.memory_space<vmem>>, vector<8x384xbf16>
    %c0_53 = arith.constant 0 : index
    %c750_54 = arith.constant 750 : index
    %60 = vector.load %arg10[%c0_53, %c750_54] : memref<8x1280xbf16, #tpu.memory_space<vmem>>, vector<8x384xbf16>
    %c0_55 = arith.constant 0 : index
    %c751_56 = arith.constant 751 : index
    %61 = vector.load %arg10[%c0_55, %c751_56] : memref<8x1280xbf16, #tpu.memory_space<vmem>>, vector<8x384xbf16>
    %c0_57 = arith.constant 0 : index
    %c767_58 = arith.constant 767 : index
    %62 = vector.load %arg10[%c0_57, %c767_58] : memref<8x1280xbf16, #tpu.memory_space<vmem>>, vector<8x384xbf16>
    %c0_59 = arith.constant 0 : index
    %c768_60 = arith.constant 768 : index
    %63 = vector.load %arg10[%c0_59, %c768_60] : memref<8x1280xbf16, #tpu.memory_space<vmem>>, vector<8x384xbf16>
    %c0_61 = arith.constant 0 : index
    %c769_62 = arith.constant 769 : index
    %64 = vector.load %arg10[%c0_61, %c769_62] : memref<8x1280xbf16, #tpu.memory_space<vmem>>, vector<8x384xbf16>
    %c0_63 = arith.constant 0 : index
    %c785_64 = arith.constant 785 : index
    %65 = vector.load %arg10[%c0_63, %c785_64] : memref<8x1280xbf16, #tpu.memory_space<vmem>>, vector<8x384xbf16>
    %c0_65 = arith.constant 0 : index
    %c786_66 = arith.constant 786 : index
    %66 = vector.load %arg10[%c0_65, %c786_66] : memref<8x1280xbf16, #tpu.memory_space<vmem>>, vector<8x384xbf16>
    %c0_67 = arith.constant 0 : index
    %c787_68 = arith.constant 787 : index
    %67 = vector.load %arg10[%c0_67, %c787_68] : memref<8x1280xbf16, #tpu.memory_space<vmem>>, vector<8x384xbf16>
    %68 = tpu.concatenate %59, %60, %61, %62, %63, %64, %65, %66, %67 in 0 : vector<8x384xbf16>, vector<8x384xbf16>, vector<8x384xbf16>, vector<8x384xbf16>, vector<8x384xbf16>, vector<8x384xbf16>, vector<8x384xbf16>, vector<8x384xbf16>, vector<8x384xbf16> -> vector<72x384xbf16>
    %69 = tpu.concatenate %58, %68 in 1 : vector<72x384xbf16>, vector<72x384xbf16> -> vector<72x768xbf16>
    %cst_69 = arith.constant dense<0.000000e+00> : vector<4x768xf32>
    %70 = tpu.matmul %48, %69, %cst_69 {dimension_numbers = #tpu.dot_dimension_numbers<[1], [0], [0], [1], [0, 0, 1, 1], [], []>} : vector<4x72xbf16>, vector<72x768xbf16>, vector<4x768xf32> -> vector<4x768xf32>
    %c0_70 = arith.constant 0 : index
    %c0_71 = arith.constant 0 : index
    %71 = vector.load %arg8[%c0_70, %c0_71] : memref<4x1xf32, #tpu.memory_space<vmem>>, vector<4x1xf32>
    %72 = vector.broadcast %71 : vector<4x1xf32> to vector<4x768xf32>
    %73 = arith.addf %70, %72 : vector<4x768xf32>
    %74 = vector.broadcast %0 : vector<1x768xf32> to vector<4x768xf32>
    %75 = arith.mulf %73, %74 : vector<4x768xf32>
    %76 = vector.extract_strided_slice %75 {offsets = [0, 0], sizes = [4, 384], strides = [1, 1]} : vector<4x768xf32> to vector<4x384xf32>
    %c0_72 = arith.constant 0 : index
    %c128_73 = arith.constant 128 : index
    %77 = vector.load %arg1[%c0_72, %c128_73] : memref<4x1280xbf16, #tpu.memory_space<vmem>>, vector<4x384xbf16>
    %78 = arith.extf %77 : vector<4x384xbf16> to vector<4x384xf32>
    %79 = arith.addf %76, %78 : vector<4x384xf32>
    %80 = arith.truncf %79 : vector<4x384xf32> to vector<4x384xbf16>
    %81 = vector.extract_strided_slice %75 {offsets = [0, 384], sizes = [4, 384], strides = [1, 1]} : vector<4x768xf32> to vector<4x384xf32>
    %c0_74 = arith.constant 0 : index
    %c768_75 = arith.constant 768 : index
    %82 = vector.load %arg1[%c0_74, %c768_75] : memref<4x1280xbf16, #tpu.memory_space<vmem>>, vector<4x384xbf16>
    %83 = arith.extf %82 : vector<4x384xbf16> to vector<4x384xf32>
    %84 = arith.addf %81, %83 : vector<4x384xf32>
    %85 = arith.truncf %84 : vector<4x384xf32> to vector<4x384xbf16>
    %cst_76 = arith.constant 0.000000e+00 : bf16
    %86 = vector.broadcast %cst_76 : bf16 to vector<4x128xbf16>
    %cst_77 = arith.constant 0.000000e+00 : bf16
    %87 = vector.broadcast %cst_77 : bf16 to vector<4x128xbf16>
    %88 = tpu.concatenate %86, %80, %87 in 1 : vector<4x128xbf16>, vector<4x384xbf16>, vector<4x128xbf16> -> vector<4x640xbf16>
    %c0_78 = arith.constant 0 : index
    %c0_79 = arith.constant 0 : index
    %89 = vector.load %arg11[%c0_78, %c0_79] : memref<4x1280xbf16, #tpu.memory_space<vmem>>, vector<4x640xbf16>
    tpu.vector_store %arg11[%c0_78, %c0_79], %88 {strides = array<i32>} : memref<4x1280xbf16, #tpu.memory_space<vmem>>, vector<4x640xbf16>,
    %90 = tpu.concatenate %86, %85, %87 in 1 : vector<4x128xbf16>, vector<4x384xbf16>, vector<4x128xbf16> -> vector<4x640xbf16>
    %c0_80 = arith.constant 0 : index
    %c640_81 = arith.constant 640 : index
    %91 = vector.load %arg11[%c0_80, %c640_81] : memref<4x1280xbf16, #tpu.memory_space<vmem>>, vector<4x640xbf16>
    tpu.vector_store %arg11[%c0_80, %c640_81], %90 {strides = array<i32>} : memref<4x1280xbf16, #tpu.memory_space<vmem>>, vector<4x640xbf16>,
    %c0_82 = arith.constant 0 : index
    %c0_83 = arith.constant 0 : index
    %92 = vector.load %arg3[%c0_82, %c0_83] : memref<16x36xbf16, #tpu.memory_space<vmem>>, vector<8x36xbf16>
    %c0_84 = arith.constant 0 : index
    %c109_85 = arith.constant 109 : index
    %93 = vector.load %arg11[%c0_84, %c109_85] : memref<4x1280xbf16, #tpu.memory_space<vmem>>, vector<4x384xbf16>
    %c0_86 = arith.constant 0 : index
    %c110_87 = arith.constant 110 : index
    %94 = vector.load %arg11[%c0_86, %c110_87] : memref<4x1280xbf16, #tpu.memory_space<vmem>>, vector<4x384xbf16>
    %c0_88 = arith.constant 0 : index
    %c111_89 = arith.constant 111 : index
    %95 = vector.load %arg11[%c0_88, %c111_89] : memref<4x1280xbf16, #tpu.memory_space<vmem>>, vector<4x384xbf16>
    %c0_90 = arith.constant 0 : index
    %c127_91 = arith.constant 127 : index
    %96 = vector.load %arg11[%c0_90, %c127_91] : memref<4x1280xbf16, #tpu.memory_space<vmem>>, vector<4x384xbf16>
    %c0_92 = arith.constant 0 : index
    %c128_93 = arith.constant 128 : index
    %97 = vector.load %arg11[%c0_92, %c128_93] : memref<4x1280xbf16, #tpu.memory_space<vmem>>, vector<4x384xbf16>
    %c0_94 = arith.constant 0 : index
    %c129_95 = arith.constant 129 : index
    %98 = vector.load %arg11[%c0_94, %c129_95] : memref<4x1280xbf16, #tpu.memory_space<vmem>>, vector<4x384xbf16>
    %c0_96 = arith.constant 0 : index
    %c145_97 = arith.constant 145 : index
    %99 = vector.load %arg11[%c0_96, %c145_97] : memref<4x1280xbf16, #tpu.memory_space<vmem>>, vector<4x384xbf16>
    %c0_98 = arith.constant 0 : index
    %c146_99 = arith.constant 146 : index
    %100 = vector.load %arg11[%c0_98, %c146_99] : memref<4x1280xbf16, #tpu.memory_space<vmem>>, vector<4x384xbf16>
    %c0_100 = arith.constant 0 : index
    %c147_101 = arith.constant 147 : index
    %101 = vector.load %arg11[%c0_100, %c147_101] : memref<4x1280xbf16, #tpu.memory_space<vmem>>, vector<4x384xbf16>
    %102 = tpu.concatenate %93, %94, %95, %96, %97, %98, %99, %100, %101 in 0 : vector<4x384xbf16>, vector<4x384xbf16>, vector<4x384xbf16>, vector<4x384xbf16>, vector<4x384xbf16>, vector<4x384xbf16>, vector<4x384xbf16>, vector<4x384xbf16>, vector<4x384xbf16> -> vector<36x384xbf16>
    %c0_102 = arith.constant 0 : index
    %c749_103 = arith.constant 749 : index
    %103 = vector.load %arg11[%c0_102, %c749_103] : memref<4x1280xbf16, #tpu.memory_space<vmem>>, vector<4x384xbf16>
    %c0_104 = arith.constant 0 : index
    %c750_105 = arith.constant 750 : index
    %104 = vector.load %arg11[%c0_104, %c750_105] : memref<4x1280xbf16, #tpu.memory_space<vmem>>, vector<4x384xbf16>
    %c0_106 = arith.constant 0 : index
    %c751_107 = arith.constant 751 : index
    %105 = vector.load %arg11[%c0_106, %c751_107] : memref<4x1280xbf16, #tpu.memory_space<vmem>>, vector<4x384xbf16>
    %c0_108 = arith.constant 0 : index
    %c767_109 = arith.constant 767 : index
    %106 = vector.load %arg11[%c0_108, %c767_109] : memref<4x1280xbf16, #tpu.memory_space<vmem>>, vector<4x384xbf16>
    %c0_110 = arith.constant 0 : index
    %c768_111 = arith.constant 768 : index
    %107 = vector.load %arg11[%c0_110, %c768_111] : memref<4x1280xbf16, #tpu.memory_space<vmem>>, vector<4x384xbf16>
    %c0_112 = arith.constant 0 : index
    %c769_113 = arith.constant 769 : index
    %108 = vector.load %arg11[%c0_112, %c769_113] : memref<4x1280xbf16, #tpu.memory_space<vmem>>, vector<4x384xbf16>
    %c0_114 = arith.constant 0 : index
    %c785_115 = arith.constant 785 : index
    %109 = vector.load %arg11[%c0_114, %c785_115] : memref<4x1280xbf16, #tpu.memory_space<vmem>>, vector<4x384xbf16>
    %c0_116 = arith.constant 0 : index
    %c786_117 = arith.constant 786 : index
    %110 = vector.load %arg11[%c0_116, %c786_117] : memref<4x1280xbf16, #tpu.memory_space<vmem>>, vector<4x384xbf16>
    %c0_118 = arith.constant 0 : index
    %c787_119 = arith.constant 787 : index
    %111 = vector.load %arg11[%c0_118, %c787_119] : memref<4x1280xbf16, #tpu.memory_space<vmem>>, vector<4x384xbf16>
    %112 = tpu.concatenate %103, %104, %105, %106, %107, %108, %109, %110, %111 in 0 : vector<4x384xbf16>, vector<4x384xbf16>, vector<4x384xbf16>, vector<4x384xbf16>, vector<4x384xbf16>, vector<4x384xbf16>, vector<4x384xbf16>, vector<4x384xbf16>, vector<4x384xbf16> -> vector<36x384xbf16>
    %113 = tpu.concatenate %102, %112 in 1 : vector<36x384xbf16>, vector<36x384xbf16> -> vector<36x768xbf16>
    %cst_120 = arith.constant dense<0.000000e+00> : vector<8x768xf32>
    %114 = tpu.matmul %92, %113, %cst_120 {dimension_numbers = #tpu.dot_dimension_numbers<[1], [0], [0], [1], [0, 0, 1, 1], [], []>} : vector<8x36xbf16>, vector<36x768xbf16>, vector<8x768xf32> -> vector<8x768xf32>
    %c0_121 = arith.constant 0 : index
    %c0_122 = arith.constant 0 : index
    %115 = vector.load %arg4[%c0_121, %c0_122] : memref<16x1xf32, #tpu.memory_space<vmem>>, vector<8x1xf32>
    %116 = vector.broadcast %115 : vector<8x1xf32> to vector<8x768xf32>
    %117 = arith.addf %114, %116 : vector<8x768xf32>
    %cst_123 = arith.constant 0.000000e+00 : f32
    %118 = vector.broadcast %cst_123 : f32 to vector<8x768xf32>
    %119 = arith.maximumf %117, %118 : vector<8x768xf32>
    %120 = vector.broadcast %0 : vector<1x768xf32> to vector<8x768xf32>
    %121 = arith.mulf %119, %120 : vector<8x768xf32>
    %122 = vector.extract_strided_slice %121 {offsets = [0, 0], sizes = [8, 384], strides = [1, 1]} : vector<8x768xf32> to vector<8x384xf32>
    %cst_124 = arith.constant dense<0.000000e+00> : vector<8xf32>
    %123 = vector.multi_reduction <add>, %122, %cst_124 [1] : vector<8x384xf32> to vector<8xf32>
    %124 = vector.shape_cast %123 : vector<8xf32> to vector<8x1xf32>
    %125 = vector.extract_strided_slice %121 {offsets = [0, 384], sizes = [8, 384], strides = [1, 1]} : vector<8x768xf32> to vector<8x384xf32>
    %cst_125 = arith.constant dense<0.000000e+00> : vector<8xf32>
    %126 = vector.multi_reduction <add>, %125, %cst_125 [1] : vector<8x384xf32> to vector<8xf32>
    %127 = vector.shape_cast %126 : vector<8xf32> to vector<8x1xf32>
    %128 = tpu.concatenate %34, %37, %124, %127 in 1 : vector<8x1xf32>, vector<8x1xf32>, vector<8x1xf32>, vector<8x1xf32> -> vector<8x4xf32>
    %cst_126 = arith.constant 3.906250e-03 : f32
    %129 = vector.broadcast %cst_126 : f32 to vector<8x4xf32>
    %130 = arith.mulf %128, %129 : vector<8x4xf32>
    %c0_127 = arith.constant 0 : index
    %c0_128 = arith.constant 0 : index
    %131 = vector.load %arg5[%c0_127, %c0_128] : memref<10x8xbf16, #tpu.memory_space<vmem>>, vector<10x8xbf16>
    %132 = arith.truncf %130 : vector<8x4xf32> to vector<8x4xbf16>
    %cst_129 = arith.constant dense<0.000000e+00> : vector<10x4xf32>
    %133 = tpu.matmul %131, %132, %cst_129 {dimension_numbers = #tpu.dot_dimension_numbers<[1], [0], [0], [1], [0, 0, 1, 1], [], []>} : vector<10x8xbf16>, vector<8x4xbf16>, vector<10x4xf32> -> vector<10x4xf32>
    %c0_130 = arith.constant 0 : index
    %c0_131 = arith.constant 0 : index
    %134 = vector.load %arg6[%c0_130, %c0_131] : memref<10x1xf32, #tpu.memory_space<vmem>>, vector<10x1xf32>
    %135 = vector.broadcast %134 : vector<10x1xf32> to vector<10x4xf32>
    %136 = arith.addf %133, %135 : vector<10x4xf32>
    %137 = vector.shape_cast %136 : vector<10x4xf32> to vector<1x10x4xf32>
    %c0_132 = arith.constant 0 : index
    %c0_133 = arith.constant 0 : index
    %c0_134 = arith.constant 0 : index
    %138 = vector.load %arg9[%c0_132, %c0_133, %c0_134] : memref<1x10x4xf32, #tpu.memory_space<vmem>>, vector<1x10x4xf32>
    tpu.vector_store %arg9[%c0_132, %c0_133, %c0_134], %137 {strides = array<i32>} : memref<1x10x4xf32, #tpu.memory_space<vmem>>, vector<1x10x4xf32>,
    return
  }
  func.func @transform_0(%arg0: i32) -> (i32, i32) {
    %c0_i32 = arith.constant 0 : i32
    %c0_i32_0 = arith.constant 0 : i32
    return %c0_i32, %arg0 : i32, i32
  }
  func.func @transform_1(%arg0: i32) -> (i32, i32) {
    %c0_i32 = arith.constant 0 : i32
    %c0_i32_0 = arith.constant 0 : i32
    %c0_i32_1 = arith.constant 0 : i32
    return %c0_i32, %c0_i32_0 : i32, i32
  }
  func.func @transform_2(%arg0: i32) -> (i32, i32) {
    %c0_i32 = arith.constant 0 : i32
    %c0_i32_0 = arith.constant 0 : i32
    %c0_i32_1 = arith.constant 0 : i32
    return %c0_i32, %c0_i32_0 : i32, i32
  }
  func.func @transform_3(%arg0: i32) -> (i32, i32) {
    %c0_i32 = arith.constant 0 : i32
    %c0_i32_0 = arith.constant 0 : i32
    %c0_i32_1 = arith.constant 0 : i32
    return %c0_i32, %c0_i32_0 : i32, i32
  }
  func.func @transform_4(%arg0: i32) -> (i32, i32) {
    %c0_i32 = arith.constant 0 : i32
    %c0_i32_0 = arith.constant 0 : i32
    %c0_i32_1 = arith.constant 0 : i32
    return %c0_i32, %c0_i32_0 : i32, i32
  }
  func.func @transform_5(%arg0: i32) -> (i32, i32) {
    %c0_i32 = arith.constant 0 : i32
    %c0_i32_0 = arith.constant 0 : i32
    %c0_i32_1 = arith.constant 0 : i32
    return %c0_i32, %c0_i32_0 : i32, i32
  }
  func.func @transform_6(%arg0: i32) -> (i32, i32) {
    %c0_i32 = arith.constant 0 : i32
    %c0_i32_0 = arith.constant 0 : i32
    %c0_i32_1 = arith.constant 0 : i32
    return %c0_i32, %c0_i32_0 : i32, i32
  }
  func.func @transform_7(%arg0: i32) -> (i32, i32) {
    %c0_i32 = arith.constant 0 : i32
    %c0_i32_0 = arith.constant 0 : i32
    %c0_i32_1 = arith.constant 0 : i32
    return %c0_i32, %c0_i32_0 : i32, i32
  }
  func.func @transform_8(%arg0: i32) -> (i32, i32, i32) {
    %c0_i32 = arith.constant 0 : i32
    %c0_i32_0 = arith.constant 0 : i32
    %c0_i32_1 = arith.constant 0 : i32
    return %arg0, %c0_i32, %c0_i32_0 : i32, i32, i32
  }
}

</mosaic_0001>

<bundles_post_ra>
// kernel: _denoise_pipeline.1
= control target key start
LH: loop header
LB: loop body
LE: loop exit
PB: predicated region body
PF: predicated region fallthrough
CT: control target
= control target key end

     0   :  { %s2668_s27 = smov 0   ;;  %s3892_s0 = inlined_call_operand.vmem [shape: bf16[4,2560], index: 0, kind: input, shape index: {}]   ;;  %s3893_s1 = inlined_call_operand.vmem [shape: f32[1,768], index: 1, kind: input, shape index: {}]   ;;  %s3894_s2 = inlined_call_operand.vmem [shape: bf16[16,36], index: 2, kind: input, shape index: {}]   ;;  %s3895_s3 = inlined_call_operand.vmem [shape: f32[16,1], index: 3, kind: input, shape index: {}]   ;;  %s3896_s4 = inlined_call_operand.vmem [shape: bf16[10,8], index: 4, kind: input, shape index: {}]   ;;  %s3897_s5 = inlined_call_operand.vmem [shape: f32[10,1], index: 5, kind: input, shape index: {}]   ;;  %s3898_s6 = inlined_call_operand.vmem [shape: bf16[4,72], index: 6, kind: input, shape index: {}]   ;;  %s3899_s7 = inlined_call_operand.vmem [shape: f32[4,1], index: 7, kind: input, shape index: {}]   ;;  %s3900_s8 = inlined_call_operand.vmem [shape: f32[2,10,4], index: 8, kind: output, shape index: {}]  }
   0x1 LB: > { %s2674_s28 = sadd.s32 4294967295, %s2611_s27   ;;  %p2532_p0 = scmp.ge.s32.totalorder %s2611_s27, 1  ;;  %s2611_s27 = sphi %s2668_s27, %s18_s27  }
   0x2   : > { %p263_p1 = scmp.lt.s32.totalorder %s2611_s27, 3 }
   0x4   : > { %p264_p2 = pnand %p2532_p0, %p263_p1 }
   0x5   : > { %s297_s29 = smul.u32 (!%p264_p2), 10, %s2674_s28  ;;  %s2613_s12 = smov (!%p264_p2), 127  }
   0x6   : > { %267 = sbr.rel (%p264_p2) target bundleno = 1959 (0x7a7), region = 52  ;;  %s2614_s13 = smov (!%p264_p2), 126  }
   0x7   : > { %p298_p3 = scmp.lt.s32.totalorder (!%p264_p2), %s297_s29, 19  ;;  %s2615_s14 = smov (!%p264_p2), 110  }
   0x8   : > { %s2616_s15 = smov (!%p264_p2), 109   ;;  %s2617_s16 = smov (!%p264_p2), 108  }
   0x9   : > { %s2618_s17 = smov (!%p264_p2), 92   ;;  %s2619_s18 = smov (!%p264_p2), 91  }
   0xa   : > { %s2620_s19 = smov (!%p264_p2), 90   ;;  %s2621_s20 = smov (!%p264_p2), 19  }
   0xb   : > { %s3902_s29 = smov (!%p298_p3, %s297_s29), 19  ;;  %vm339_vm0 = vcmask 1039360   ;;  %vm361_vm1 = vcmask 1031168   ;;  %vm492_vm2 = vcmask 1041408   ;;  %vm383_vm3 = vcmask 900096   ;;  %p303_p4 = scmp.lt.s32.totalorder %s2674_s28, 1 }
   0xc   : > { %s2533_s30 = sshll.u32 %s3902_s29, 1  ;;  %vm501_vm4 = vcmask 1043456   ;;  %vm510_vm5 = vcmask 1045504   ;;  %vm423_vm6 = vcmask 883712   ;;  %vm445_vm7 = vcmask 752640  }
   0xd   : > { %s2682_s11 = scalar_lea.vmem %s3892_s0, %s2533_s30  ;;  %vm467_vm8 = vcmask 744448   ;;  %vm401_vm9 = vcmask 891904   ;;  %vm488_vm10 = vcmask 736256   ;;  %vm803_vm11 = vcmask 154624   ;;  %s3904_s28 = smov (!%p303_p4, %s2674_s28), 1 }
   0xe   : > { %v312_v0 = vld [vmem:[%s2682_s11] sm:$0xff]  ;;  %v547_v34 = vld [vmem:[%s2682_s11 + $0xa] sm:$0xff]  ;;  %vm883_vm12 = vcmask 293888   ;;  %vm1567_vm13 = vcmask 588800   ;;  %vm1725_vm14 = vcmask 1045508   ;;  %vm2421_vm15 = vcmask 7168  }
   0xf   : > { %316 = vst [vmem:[#allocation1] ss:$4 sm:$0xff] %v312_v0  ;;  %v313_v13 = vld [vmem:[%s2682_s11 + $0x2] sm:$0x3f]  ;;  %v548_v52 = vld [vmem:[%s2682_s11 + $0xc] sm:$0x3f] }
  0x10   : > { %v314_v18 = vld [vmem:[%s2682_s11 + $0x2] sm:$0xff]  ;;  %v549_v58 = vld [vmem:[%s2682_s11 + $0xc] sm:$0xff]  ;;  %s2565_s23 = sshll.u32 %s3904_s28, 4 }
  0x11   : > { %s307_s26 = scalar_lea.vmem %s3900_s8, %s2565_s23 }
  0x16   : > { %v2685_v1 = vld.sshfl [vmem:[#allocation1] sm:$0xff pattern:$0x73625140]  ;;  %v2687_v2 = vld.sshfl [vmem:[#allocation1 + $0x8] sm:$0xff pattern:$0x73625140] }
  0x17   : > { %v2689_v3 = vld.sshfl [vmem:[#allocation1 + $0x10] sm:$0xff pattern:$0x73625140]  ;;  %v2691_v4 = vld.sshfl [vmem:[#allocation1 + $0x18] sm:$0xff pattern:$0x73625140] }
  0x18   : > { %322 = vst [vmem:[#allocation1 + $0x1] ss:$4 sm:$0xff] %v312_v0 }
  0x1f   : > { %v329_v5 = vld.sshfl [vmem:[#allocation1 + $0x18] sm:$0xff pattern:$0x73625140]  ;;  %v325_v6 = vld.sshfl [vmem:[#allocation1 + $0x8] sm:$0xff pattern:$0x73625140] }
  0x20   : > { %337 = vrot.lane.b32.xlu0 %v329_v5, %s2613_s12  ;;  %v323_v7 = vld.sshfl [vmem:[#allocation1] sm:$0xff pattern:$0x73625140]  ;;  %v327_v8 = vld.sshfl [vmem:[#allocation1 + $0x10] sm:$0xff pattern:$0x73625140] }
  0x21   : > { %331 = vrot.lane.b32.xlu1 %v323_v7, %s2613_s12  ;;  %335 = vrot.lane.b32.xlu2 %v327_v8, %s2613_s12  ;;  %344 = vst [vmem:[#allocation1 + $0x2] ss:$4 sm:$0xff] %v312_v0 }
  0x28   : > { %v351_v9 = vld.sshfl [vmem:[#allocation1 + $0x18] sm:$0xff pattern:$0x73625140]  ;;  %v349_v10 = vld.sshfl [vmem:[#allocation1 + $0x10] sm:$0xff pattern:$0x73625140] }
  0x29   : > { %359 = vrot.lane.b32.xlu0 %v351_v9, %s2614_s13  ;;  %v347_v11 = vld.sshfl [vmem:[#allocation1 + $0x8] sm:$0xff pattern:$0x73625140]  ;;  %333 = vrot.lane.b32.xlu2 %v325_v6, %s2613_s12  ;;  %v345_v12 = vld.sshfl [vmem:[#allocation1] sm:$0xff pattern:$0x73625140] }
  0x2a   : > { %355 = vrot.lane.b32.xlu1 %v347_v11, %s2614_s13  ;;  %366 = vst [vmem:[#allocation1 + $0x3] ss:$4 sm:$0xff] %v312_v0 }
  0x31   : > { %353 = vrot.lane.b32.xlu0 %v345_v12, %s2614_s13  ;;  %v371_v14 = vld.sshfl [vmem:[#allocation1 + $0x10] sm:$0xff pattern:$0x73625140]  ;;  %v373_v15 = vld.sshfl [vmem:[#allocation1 + $0x18] sm:$0xff pattern:$0x73625140]  ;;  %357 = vrot.lane.b32.xlu2 %v349_v10, %s2614_s13 }
  0x32   : > { %379 = vrot.lane.b32.xlu1 %v371_v14, %s2615_s14  ;;  %v367_v16 = vld.sshfl [vmem:[#allocation1] sm:$0xff pattern:$0x73625140]  ;;  %v369_v17 = vld.sshfl [vmem:[#allocation1 + $0x8] sm:$0xff pattern:$0x73625140] }
  0x33   : > { %388 = vst [vmem:[#allocation1] ss:$4 sm:$0xff] %v313_v13 }
  0x39   : > { %377 = vrot.lane.b32.xlu0 %v369_v17, %s2615_s14  ;;  %381 = vrot.lane.b32.xlu2 %v373_v15, %s2615_s14 }
  0x3a   : > { %v391_v19 = vld.sshfl [vmem:[#allocation1 + $0x8] sm:$0xff pattern:$0x73625140]  ;;  %v393_v20 = vld.sshfl [vmem:[#allocation1 + $0x10] sm:$0xff pattern:$0x73625140] }
  0x3b   : > { %397 = vrot.lane.b32.xlu1 %v391_v19, %s2616_s15  ;;  %v389_v21 = vld.sshfl [vmem:[#allocation1] sm:$0xff pattern:$0x73625140] }
  0x3c   : > { %406 = vst [vmem:[#allocation1 + $0x1] ss:$4 sm:$0xff] %v314_v18 }
  0x41   : > { %395 = vrot.lane.b32.xlu0 %v389_v21, %s2616_s15  ;;  %375 = vrot.lane.b32.xlu2 %v367_v16, %s2615_s14 }
  0x43   : > { %v413_v22 = vld.sshfl [vmem:[#allocation1 + $0x18] sm:$0xff pattern:$0x73625140]  ;;  %v409_v23 = vld.sshfl [vmem:[#allocation1 + $0x8] sm:$0xff pattern:$0x73625140] }
  0x44   : > { %421 = vrot.lane.b32.xlu1 %v413_v22, %s2617_s16  ;;  %v411_v24 = vld.sshfl [vmem:[#allocation1 + $0x10] sm:$0xff pattern:$0x73625140]  ;;  %v407_v25 = vld.sshfl [vmem:[#allocation1] sm:$0xff pattern:$0x73625140] }
  0x45   : > { %428 = vst [vmem:[#allocation1 + $0x2] ss:$4 sm:$0xff] %v314_v18 }
  0x49   : > { %419 = vrot.lane.b32.xlu0 %v411_v24, %s2617_s16  ;;  %399 = vrot.lane.b32.xlu2 %v393_v20, %s2616_s15 }
  0x4c   : > { %415 = vrot.lane.b32.xlu1 %v407_v25, %s2617_s16  ;;  %v435_v26 = vld.sshfl [vmem:[#allocation1 + $0x18] sm:$0xff pattern:$0x73625140]  ;;  %v429_v27 = vld.sshfl [vmem:[#allocation1] sm:$0xff pattern:$0x73625140] }
  0x4d   : > { %v431_v28 = vld.sshfl [vmem:[#allocation1 + $0x8] sm:$0xff pattern:$0x73625140]  ;;  %v433_v29 = vld.sshfl [vmem:[#allocation1 + $0x10] sm:$0xff pattern:$0x73625140] }
  0x4e   : > { %450 = vst [vmem:[#allocation1 + $0x3] ss:$4 sm:$0xff] %v314_v18 }
  0x51   : > { %441 = vrot.lane.b32.xlu0 %v433_v29, %s2618_s17  ;;  %417 = vrot.lane.b32.xlu2 %v409_v23, %s2617_s16  ;;  %v1673_v23 = vld [vmem:[%s2682_s11 + $0x2] sm:$0x3f] }
  0x52   : > { %v1674_v25 = vunpack.c.l.bf16 %v1673_v23 }
  0x54   : > { %443 = vrot.lane.b32.xlu1 %v435_v26, %s2618_s17 }
  0x55   : > { %v457_v30 = vld.sshfl [vmem:[#allocation1 + $0x18] sm:$0xff pattern:$0x73625140]  ;;  %v453_v31 = vld.sshfl [vmem:[#allocation1 + $0x8] sm:$0xff pattern:$0x73625140] }
  0x56   : > { %v455_v32 = vld.sshfl [vmem:[#allocation1 + $0x10] sm:$0xff pattern:$0x73625140]  ;;  %v451_v33 = vld.sshfl [vmem:[#allocation1] sm:$0xff pattern:$0x73625140] }
  0x57   : > { %471 = vst [vmem:[#allocation1] ss:$4 sm:$0xff] %v314_v18 }
  0x59   : > { %463 = vrot.lane.b32.xlu0 %v455_v32, %s2619_s18  ;;  %439 = vrot.lane.b32.xlu2 %v431_v28, %s2618_s17  ;;  %v1675_v28 = vunpack.c.h.bf16 %v1673_v23 }
  0x5c   : > { %465 = vrot.lane.b32.xlu1 %v457_v30, %s2619_s18 }
  0x5e   : > { %v478_v35 = vld.sshfl [vmem:[#allocation1 + $0x18] sm:$0xff pattern:$0x73625140]  ;;  %v474_v36 = vld.sshfl [vmem:[#allocation1 + $0x8] sm:$0xff pattern:$0x73625140] }
  0x5f   : > { %v472_v37 = vld.sshfl [vmem:[#allocation1] sm:$0xff pattern:$0x73625140]  ;;  %v476_v38 = vld.sshfl [vmem:[#allocation1 + $0x10] sm:$0xff pattern:$0x73625140] }
  0x60   : > { %551 = vst [vmem:[#allocation1] ss:$4 sm:$0xff] %v547_v34 }
  0x61   : > { %459 = vrot.lane.b32.xlu0 %v451_v33, %s2619_s18  ;;  %437 = vrot.lane.b32.xlu2 %v429_v27, %s2618_s17 }
  0x64   : > { %486 = vrot.lane.b32.xlu1 %v478_v35, %s2620_s19 }
  0x67   : > { %v2723_v39 = vld.sshfl [vmem:[#allocation1] sm:$0xff pattern:$0x73625140]  ;;  %v2725_v40 = vld.sshfl [vmem:[#allocation1 + $0x8] sm:$0xff pattern:$0x73625140] }
  0x68   : > { %v2727_v41 = vld.sshfl [vmem:[#allocation1 + $0x10] sm:$0xff pattern:$0x73625140]  ;;  %v2729_v42 = vld.sshfl [vmem:[#allocation1 + $0x18] sm:$0xff pattern:$0x73625140] }
  0x69   : > { %482 = vrot.lane.b32.xlu0 %v474_v36, %s2620_s19  ;;  %461 = vrot.lane.b32.xlu2 %v453_v31, %s2619_s18  ;;  %557 = vst [vmem:[#allocation1 + $0x1] ss:$4 sm:$0xff] %v547_v34 }
  0x6c   : > { %480 = vrot.lane.b32.xlu1 %v472_v37, %s2620_s19 }
  0x70   : > { %v562_v43 = vld.sshfl [vmem:[#allocation1 + $0x10] sm:$0xff pattern:$0x73625140]  ;;  %v2734_v44 = vld.sshfl [vmem:[#allocation1 + $0x18] sm:$0xff pattern:$0x73625140] }
  0x71   : > { %484 = vrot.lane.b32.xlu0 %v476_v38, %s2620_s19  ;;  %v560_v45 = vld.sshfl [vmem:[#allocation1 + $0x8] sm:$0xff pattern:$0x73625140]  ;;  %v558_v46 = vld.sshfl [vmem:[#allocation1] sm:$0xff pattern:$0x73625140] }
  0x72   : > { %566 = vrot.lane.b32.xlu2 %v558_v46, %s2613_s12  ;;  %578 = vst [vmem:[#allocation1 + $0x2] ss:$4 sm:$0xff] %v547_v34 }
  0x74   : > { %570 = vrot.lane.b32.xlu1 %v562_v43, %s2613_s12 }
  0x79   : > { %568 = vrot.lane.b32.xlu0 %v560_v45, %s2613_s12  ;;  %v2740_v47 = vld.sshfl [vmem:[#allocation1] sm:$0xff pattern:$0x73625140]  ;;  %v2742_v48 = vld.sshfl [vmem:[#allocation1 + $0x8] sm:$0xff pattern:$0x73625140] }
  0x7a   : > { %v2744_v49 = vld.sshfl [vmem:[#allocation1 + $0x10] sm:$0xff pattern:$0x73625140]  ;;  %v2746_v50 = vld.sshfl [vmem:[#allocation1 + $0x18] sm:$0xff pattern:$0x73625140] }
  0x7b   : > { %v2748_v51 = vpop.permute.xlu2 %335  ;;  %599 = vst [vmem:[#allocation1 + $0x3] ss:$4 sm:$0xff] %v547_v34 }
  0x82   : > { %v2751_v53 = vld.sshfl [vmem:[#allocation1] sm:$0xff pattern:$0x73625140]  ;;  %v2753_v54 = vld.sshfl [vmem:[#allocation1 + $0x8] sm:$0xff pattern:$0x73625140] }
  0x83   : > { %v2755_v55 = vld.sshfl [vmem:[#allocation1 + $0x10] sm:$0xff pattern:$0x73625140]  ;;  %v2757_v56 = vld.sshfl [vmem:[#allocation1 + $0x18] sm:$0xff pattern:$0x73625140]  ;;  %v2759_v57 = vpop.permute.xlu2 %333 }
  0x84   : > { %620 = vst [vmem:[#allocation1] ss:$4 sm:$0xff] %v548_v52  ;;  %v341_v32 = vsel %vm339_vm0, %v2759_v57, %v2748_v51 }
  0x85   : > { %v496_v43 = vsel %vm492_vm2, %v2687_v2, %v341_v32 }
  0x8b   : > { %v623_v59 = vld.sshfl [vmem:[#allocation1 + $0x8] sm:$0xff pattern:$0x73625140]  ;;  %v2762_v60 = vld.sshfl [vmem:[#allocation1 + $0x10] sm:$0xff pattern:$0x73625140]  ;;  %v358_v62 = vpop.permute.xlu2 %357 }
  0x8c   : > { %629 = vrot.lane.b32.xlu1 %v623_v59, %s2616_s15  ;;  %v621_v61 = vld.sshfl [vmem:[#allocation1] sm:$0xff pattern:$0x73625140] }
  0x8d   : > { %637 = vst [vmem:[#allocation1 + $0x1] ss:$4 sm:$0xff] %v549_v58  ;;  %627 = vrot.lane.b32.xlu0 %v621_v61, %s2616_s15 }
  0x92   : > { %v2766_v63 = vpop.permute.xlu0 %337 }
  0x93   : > { %v2768_v0 = vpop.permute.xlu1 %331  ;;  %v2776_v9 = vpop.permute.xlu2 %381  ;;  %v342_v34 = vsel %vm339_vm0, %v2748_v51, %v2766_v63  ;;  %v500_v2 = vsel %vm492_vm2, %v2691_v4, %v2766_v63 }
  0x94   : > { %v640_v5 = vld.sshfl [vmem:[#allocation1 + $0x8] sm:$0xff pattern:$0x73625140]  ;;  %v2770_v6 = vld.sshfl [vmem:[#allocation1 + $0x10] sm:$0xff pattern:$0x73625140]  ;;  %v498_v46 = vsel %vm492_vm2, %v2689_v3, %v342_v34 }
  0x95   : > { %v2772_v7 = vld.sshfl [vmem:[#allocation1 + $0x18] sm:$0xff pattern:$0x73625140]  ;;  %v638_v8 = vld.sshfl [vmem:[#allocation1] sm:$0xff pattern:$0x73625140]  ;;  %648 = vrot.lane.b32.xlu0 %v640_v5, %s2617_s16 }
  0x96   : > { %646 = vrot.lane.b32.xlu2 %v638_v8, %s2617_s16  ;;  %658 = vst [vmem:[#allocation1 + $0x2] ss:$4 sm:$0xff] %v549_v58 }
  0x9b   : > { %v360_v10 = vpop.permute.xlu0 %359  ;;  %v376_v16 = vpop.permute.xlu2 %375 }
  0x9c   : > { %v2778_v11 = vpop.permute.xlu1 %355  ;;  %v364_v36 = vsel %vm361_vm1, %v358_v62, %v360_v10  ;;  %v509_v5 = vsel %vm501_vm4, %v500_v2, %v360_v10 }
  0x9d   : > { %v659_v12 = vld.sshfl [vmem:[#allocation1] sm:$0xff pattern:$0x73625140]  ;;  %v2780_v13 = vld.sshfl [vmem:[#allocation1 + $0x10] sm:$0xff pattern:$0x73625140]  ;;  %v363_v35 = vsel %vm361_vm1, %v2778_v11, %v358_v62  ;;  %v507_v52 = vsel %vm501_vm4, %v498_v46, %v364_v36 }
  0x9e   : > { %v2782_v14 = vld.sshfl [vmem:[#allocation1 + $0x18] sm:$0xff pattern:$0x73625140]  ;;  %667 = vrot.lane.b32.xlu1 %v659_v12, %s2618_s17  ;;  %v661_v15 = vld.sshfl [vmem:[#allocation1 + $0x8] sm:$0xff pattern:$0x73625140]  ;;  %v505_v51 = vsel %vm501_vm4, %v496_v43, %v363_v35  ;;  %v518_v12 = vsel %vm510_vm5, %v509_v5, %v2776_v9 }
  0x9f   : > { %669 = vrot.lane.b32.xlu2 %v661_v15, %s2618_s17  ;;  %679 = vst [vmem:[#allocation1 + $0x3] ss:$4 sm:$0xff] %v549_v58 }
  0xa3   : > { %v354_v17 = vpop.permute.xlu0 %353  ;;  %v2793_v26 = vpop.permute.xlu2 %399 }
  0xa4   : > { %v380_v18 = vpop.permute.xlu1 %379 }
  0xa5   : > { %v386_v45 = vsel %vm383_vm3, %v380_v18, %v2776_v9 }
  0xa6   : > { %v2786_v19 = vld.sshfl [vmem:[#allocation1 + $0x10] sm:$0xff pattern:$0x73625140]  ;;  %v2788_v20 = vld.sshfl [vmem:[#allocation1 + $0x18] sm:$0xff pattern:$0x73625140]  ;;  %v516_v61 = vsel %vm510_vm5, %v507_v52, %v386_v45 }
  0xa7   : > { %v682_v21 = vld.sshfl [vmem:[#allocation1 + $0x8] sm:$0xff pattern:$0x73625140]  ;;  %v680_v22 = vld.sshfl [vmem:[#allocation1] sm:$0xff pattern:$0x73625140] }
  0xa8   : > { %690 = vrot.lane.b32.xlu1 %v682_v21, %s2619_s18  ;;  %688 = vrot.lane.b32.xlu0 %v680_v22, %s2619_s18  ;;  %699 = vst [vmem:[#allocation1] ss:$4 sm:$0xff] %v549_v58  ;;  %v362_v21 = vsel %vm361_vm1, %v354_v17, %v2778_v11 }
  0xab   : > { %v378_v24 = vpop.permute.xlu0 %377  ;;  %v418_v62 = vpop.permute.xlu2 %417 }
  0xac   : > { %v385_v37 = vsel %vm383_vm3, %v378_v24, %v380_v18  ;;  %v340_v18 = vsel %vm339_vm0, %v2768_v0, %v2759_v57  ;;  %v384_v4 = vsel %vm383_vm3, %v376_v16, %v378_v24 }
  0xad   : > { %v2795_v27 = vpop.permute.xlu1 %397  ;;  %v514_v58 = vsel %vm510_vm5, %v505_v51, %v385_v37  ;;  %v494_v63 = vsel %vm492_vm2, %v2685_v1, %v340_v18 }
  0xae   : > { %v503_v10 = vsel %vm501_vm4, %v494_v63, %v362_v21 }
  0xaf   : > { %v702_v29 = vld.sshfl [vmem:[#allocation1 + $0x8] sm:$0xff pattern:$0x73625140]  ;;  %v700_v30 = vld.sshfl [vmem:[#allocation1] sm:$0xff pattern:$0x73625140]  ;;  %v512_v9 = vsel %vm510_vm5, %v503_v10, %v384_v4 }
  0xb0   : > { %710 = vrot.lane.b32.xlu2 %v702_v29, %s2620_s19  ;;  %708 = vrot.lane.b32.xlu1 %v700_v30, %s2620_s19  ;;  %1678 = vst [vmem:[#allocation1] ss:$2 sm:$0xff] %v1674_v25  ;;  %v706_v31 = vld.sshfl [vmem:[#allocation1 + $0x18] sm:$0xff pattern:$0x73625140] }
  0xb1   : > { %714 = vrot.lane.b32.xlu0 %v706_v31, %s2620_s19  ;;  %v704_v33 = vld.sshfl [vmem:[#allocation1 + $0x10] sm:$0xff pattern:$0x73625140] }
  0xb2   : > { %1680 = vst [vmem:[#allocation1 + $0x10] ss:$2 sm:$0xff] %v1675_v28 }
  0xb3   : > { %v396_v38 = vpop.permute.xlu0 %395  ;;  %v440_v15 = vpop.permute.xlu2 %439 }
  0xb4   : > { %v402_v31 = vsel %vm401_vm9, %v396_v38, %v2795_v27 }
  0xb6   : > { %v422_v59 = vpop.permute.xlu1 %421 }
  0xb8   : > { %712 = vrot.lane.b32.xlu2 %v704_v33, %s2620_s19  ;;  %783 = vrot.lane.b32.xlu1 %v516_v61, %s2621_s20 }
  0xb9   : > { %781 = vrot.lane.b32.xlu0 %v514_v58, %s2621_s20  ;;  %v403_v58 = vsel %vm401_vm9, %v2795_v27, %v2793_v26 }
  0xbb   : > { %v420_v3 = vpop.permute.xlu0 %419  ;;  %v438_v57 = vpop.permute.xlu2 %437 }
  0xbc   : > { %v426_v25 = vsel %vm423_vm6, %v420_v3, %v422_v59  ;;  %v446_v33 = vsel %vm445_vm7, %v438_v57, %v440_v15  ;;  %v425_v51 = vsel %vm423_vm6, %v418_v62, %v420_v3 }
  0xbd   : > { %v530_v1 = vsel %vm492_vm2, %v2793_v26, %v426_v25  ;;  %v527_v61 = vsel %vm492_vm2, %v403_v58, %v425_v51 }
  0xbe   : > { %v416_v8 = vpop.permute.xlu1 %415 }
  0xbf   : > { %v424_v17 = vsel %vm423_vm6, %v416_v8, %v418_v62  ;;  %v521_v29 = vsel %vm492_vm2, %v396_v38, %v416_v8 }
  0xc0   : > { %785 = vrot.lane.b32.xlu2 %v518_v12, %s2621_s20  ;;  %v524_v32 = vsel %vm492_vm2, %v402_v31, %v424_v17  ;;  %v532_v34 = vsel %vm501_vm4, %v521_v29, %v438_v57 }
  0xc1   : > { %v534_v45 = vsel %vm501_vm4, %v524_v32, %v446_v33 }
  0xc3   : > { %v442_v22 = vpop.permute.xlu0 %441  ;;  %v462_v35 = vpop.permute.xlu2 %461 }
  0xc4   : > { %v447_v52 = vsel %vm445_vm7, %v440_v15, %v442_v22 }
  0xc5   : > { %v536_v5 = vsel %vm501_vm4, %v527_v61, %v447_v52 }
  0xc6   : > { %v444_v23 = vpop.permute.xlu1 %443 }
  0xc7   : > { %v448_v11 = vsel %vm445_vm7, %v442_v22, %v444_v23 }
  0xc8   : > { %779 = vrot.lane.b32.xlu2 %v512_v9, %s2621_s20  ;;  %v538_v28 = vsel %vm501_vm4, %v530_v1, %v448_v11 }
  0xcb   : > { %v464_v0 = vpop.permute.xlu0 %463 }
  0xcc   : > { %v469_v59 = vsel %vm467_vm8, %v462_v35, %v464_v0 }
  0xcd   : > { %v544_v8 = vsel %vm510_vm5, %v536_v5, %v469_v59 }
  0xce   : > { %v466_v16 = vpop.permute.xlu1 %465 }
  0xcf   : > { %v470_v24 = vsel %vm467_vm8, %v464_v0, %v466_v16 }
  0xd0   : > { %v546_v30 = vsel %vm510_vm5, %v538_v28, %v470_v24 }
  0xd1   : > { %793 = vrot.lane.b32.xlu1 %v546_v30, %s2621_s20 }
  0xd3   : > { %v460_v36 = vpop.permute.xlu0 %459 }
  0xd4   : > { %v468_v37 = vsel %vm467_vm8, %v460_v36, %v462_v35  ;;  %v540_v43 = vsel %vm510_vm5, %v532_v34, %v460_v36 }
  0xd5   : > { %787 = vrot.lane.b32.xlu0 %v540_v43, %s2621_s20  ;;  %v542_v38 = vsel %vm510_vm5, %v534_v45, %v468_v37  ;;  %v2956_v37 = vld [vmem:[%s3894_s2] sm:$0xff] }
  0xd6   : > { %v487_v46 = vpop.permute.xlu1 %486 }
  0xd9   : > { %789 = vrot.lane.b32.xlu1 %v542_v38, %s2621_s20 }
  0xdb   : > { %v483_v2 = vpop.permute.xlu0 %482 }
  0xdd   : > { %791 = vrot.lane.b32.xlu0 %v544_v8, %s2621_s20 }
  0xde   : > { %v481_v62 = vpop.permute.xlu1 %480 }
  0xdf   : > { %795 = vrot.lane.b32.xlu2 %v481_v62, %s2621_s20  ;;  %v489_v26 = vsel %vm488_vm10, %v481_v62, %v483_v2 }
  0xe3   : > { %v485_v3 = vpop.permute.xlu0 %484 }
  0xe4   : > { %v491_v27 = vsel %vm488_vm10, %v485_v3, %v487_v46  ;;  %v490_v12 = vsel %vm488_vm10, %v483_v2, %v485_v3 }
  0xe5   : > { %797 = vrot.lane.b32.xlu0 %v489_v26, %s2621_s20  ;;  %799 = vrot.lane.b32.xlu1 %v490_v12, %s2621_s20 }
  0xe7   : > { %801 = vrot.lane.b32.xlu2 %v491_v27, %s2621_s20 }
  0xed   : > { %591 = vrot.lane.b32.xlu0 %v2744_v49, %s2614_s13  ;;  %587 = vrot.lane.b32.xlu1 %v2740_v47, %s2614_s13  ;;  %v2897_v47 = vpop.permute.xlu2 %566  ;;  %v2907_v49 = vpop.permute.xlu1 %570 }
  0xef   : > { %589 = vrot.lane.b32.xlu2 %v2742_v48, %s2614_s13 }
  0xf5   : > { %612 = vrot.lane.b32.xlu0 %v2755_v55, %s2615_s14  ;;  %608 = vrot.lane.b32.xlu1 %v2751_v53, %s2615_s14  ;;  %v2905_v48 = vpop.permute.xlu2 %646  ;;  %v569_v53 = vpop.permute.xlu0 %568 }
  0xf6   : > { %v574_v45 = vsel %vm339_vm0, %v2897_v47, %v569_v53  ;;  %v575_v46 = vsel %vm339_vm0, %v569_v53, %v2907_v49  ;;  %v2622_v47 = vmov 0  }
  0xf7   : > { %610 = vrot.lane.b32.xlu2 %v2753_v54, %s2615_s14  ;;  %v720_v52 = vsel %vm492_vm2, %v2723_v39, %v574_v45  ;;  %v722_v58 = vsel %vm492_vm2, %v2725_v40, %v575_v46  ;;  %v2993_v53 = vunpack.c.l.b16 %v2622_v47  ;;  %1732 = vst [vmem:[#allocation3 + $0x8] sm:$0x3] %v2622_v47  ;;  %2587 = vset.pattern.permute.xlu0 %v2622_v47 }
  0xf8   : > { %2586 = vset.pattern.permute.xlu2 %v2622_v47  ;;  %1752 = vst [vmem:[#allocation3 + $0x12] sm:$0x3] %v2622_v47  ;;  %2588 = vset.pattern.permute.xlu1 %v2622_v47 }
  0xfd   : > { %652 = vrot.lane.b32.xlu0 %v2772_v7, %s2617_s16  ;;  %631 = vrot.lane.b32.xlu1 %v2762_v60, %s2616_s15  ;;  %v2915_v54 = vpop.permute.xlu2 %669 }
  0xfe   : > { %v2917_v55 = vpop.permute.xlu1 %629 }
  0xff   : > { %650 = vrot.lane.b32.xlu2 %v2770_v6, %s2617_s16  ;;  %v2921_v60 = vpop.permute.xlu0 %627 }
 0x100   : > { %v633_v59 = vsel %vm401_vm9, %v2921_v60, %v2917_v55 }
 0x105   : > { %692 = vrot.lane.b32.xlu0 %v2786_v19, %s2619_s18  ;;  %671 = vrot.lane.b32.xlu1 %v2780_v13, %s2618_s17 }
 0x107   : > { %673 = vrot.lane.b32.xlu2 %v2782_v14, %s2618_s17 }
 0x10a   : > { %v2923_v6 = vpop.permute.xlu2 %710 }
 0x10d   : > { %593 = vrot.lane.b32.xlu0 %v2746_v50, %s2614_s13  ;;  %694 = vrot.lane.b32.xlu1 %v2788_v20, %s2619_s18  ;;  %v2927_v50 = vpop.permute.xlu0 %648 }
 0x10e   : > { %v654_v61 = vsel %vm423_vm6, %v2905_v48, %v2927_v50 }
 0x10f   : > { %572 = vrot.lane.b32.xlu2 %v2734_v44, %s2613_s12  ;;  %v748_v12 = vsel %vm492_vm2, %v633_v59, %v654_v61 }
 0x110   : > { %v2925_v7 = vpop.permute.xlu1 %667 }
 0x111   : > { %v675_v27 = vsel %vm445_vm7, %v2925_v7, %v2915_v54 }
 0x112   : > { %v2929_v13 = vpop.permute.xlu2 %712 }
 0x115   : > { %614 = vrot.lane.b32.xlu1 %v2757_v56, %s2615_s14 }
 0x11a   : > { %v2931_v14 = vpop.permute.xlu1 %690  ;;  %v2933_v44 = vpop.permute.xlu0 %688 }
 0x11b   : > { %v786_v19 = vpop.permute.xlu2 %785 }
 0x122   : > { %v2935_v20 = vpop.permute.xlu1 %708 }
 0x123   : > { %v2937_v15 = vpop.permute.xlu0 %714  ;;  %v780_v56 = vpop.permute.xlu2 %779 }
 0x12a   : > { %v784_v18 = vpop.permute.xlu1 %783 }
 0x12b   : > { %v782_v21 = vpop.permute.xlu0 %781  ;;  %v806_v36 = vsel %vm803_vm11, %v784_v18, %v786_v19 }
 0x12c   : > { %v804_v34 = vsel %vm803_vm11, %v780_v56, %v782_v21  ;;  %v805_v35 = vsel %vm803_vm11, %v782_v21, %v784_v18  ;;  %v2997_v56 = vpack.c.b16 %v2993_v53, %v2993_v53  ;;  %v696_v18 = vsel %vm467_vm8, %v2933_v44, %v2931_v14 }
 0x12d   : > { %v758_v21 = vsel %vm501_vm4, %v748_v12, %v675_v27 }
 0x12e   : > { %1053 = vst [vmem:[#allocation2 + $0x10] sm:$0xf] %v2997_v56 }
 0x12f   : > { %1065 = vst [vmem:[#allocation2 + $0x24] sm:$0xf] %v2997_v56 }
 0x139   : > { %v796_v22 = vpop.permute.xlu2 %795 }
 0x141   : > { %v802_v10 = vpop.permute.xlu2 %801 }
 0x143   : > { %v794_v4 = vpop.permute.xlu1 %793 }
 0x147   : > { %v788_v63 = vpop.permute.xlu0 %787 }
 0x149   : > { %v590_v16 = vpop.permute.xlu2 %589 }
 0x14b   : > { %v790_v23 = vpop.permute.xlu1 %789 }
 0x14c   : > { %v807_v29 = vsel %vm803_vm11, %v788_v63, %v790_v23  ;;  %v766_v63 = vsel %vm510_vm5, %v758_v21, %v696_v18 }
 0x14f   : > { %v792_v9 = vpop.permute.xlu0 %791 }
 0x150   : > { %v808_v30 = vsel %vm803_vm11, %v790_v23, %v792_v9  ;;  %v809_v31 = vsel %vm803_vm11, %v792_v9, %v794_v4 }
 0x151   : > { %v611_v43 = vpop.permute.xlu2 %610 }
 0x157   : > { %v798_v25 = vpop.permute.xlu0 %797  ;;  %v800_v57 = vpop.permute.xlu1 %799 }
 0x158   : > { %v810_v0 = vsel %vm803_vm11, %v796_v22, %v798_v25  ;;  %v811_v11 = vsel %vm803_vm11, %v798_v25, %v800_v57  ;;  %v812_v1 = vsel %vm803_vm11, %v800_v57, %v802_v10 }
 0x159   : > { %v888_v17 = vsel %vm492_vm2, %v810_v0, 0  ;;  %v891_v24 = vsel %vm492_vm2, %v811_v11, 0  ;;  %v894_v28 = vsel %vm492_vm2, %v812_v1, 0  ;;  %v651_v19 = vpop.permute.xlu2 %650 }
 0x15a   : > { %910 = vmatpush.bf16.msra.mxu0 %v888_v17  ;;  %924 = vmatpush.bf16.msra.mxu1 %v891_v24 }
 0x15b   : > { %938 = vmatpush.bf16.msra.mxu2 %v894_v28 }
 0x15e   : > { %911 = vmatpush.bf16.msra.mxu0 %v807_v29  ;;  %925 = vmatpush.bf16.msra.mxu1 %v808_v30 }
 0x15f   : > { %939 = vmatpush.bf16.msra.mxu2 %v809_v31  ;;  %v2948_v32 = vpop.permute.xlu0 %591  ;;  %v588_v33 = vpop.permute.xlu1 %587 }
 0x160   : > { %v596_v38 = vsel %vm361_vm1, %v590_v16, %v2948_v32  ;;  %v595_v51 = vsel %vm361_vm1, %v588_v33, %v590_v16 }
 0x161   : > { %v730_v3 = vsel %vm501_vm4, %v722_v58, %v596_v38  ;;  %v728_v39 = vsel %vm501_vm4, %v720_v52, %v595_v51  ;;  %v674_v10 = vpop.permute.xlu2 %673 }
 0x162   : > { %912 = vmatpush.bf16.msra.mxu0 %v804_v34  ;;  %926 = vmatpush.bf16.msra.mxu1 %v805_v35 }
 0x163   : > { %940 = vmatpush.bf16.msra.mxu2 %v806_v36 }
 0x165   : > { %2540 = vmatmul.msk.bf16.vlgmr.msra.gmra.mxu0 %vm883_vm12, %v2956_v37  ;;  %2541 = vmatmul.msk.bf16.vlgmr.msra.gmra.mxu1 %vm883_vm12, %v2956_v37 }
 0x166   : > { %2542 = vmatmul.msk.bf16.vlgmr.msra.gmra.mxu2 %vm883_vm12, %v2956_v37 }
 0x167   : > { %v613_v2 = vpop.permute.xlu0 %612  ;;  %v609_v5 = vpop.permute.xlu1 %608 }
 0x168   : > { %v617_v8 = vsel %vm383_vm3, %v611_v43, %v613_v2  ;;  %v616_v62 = vsel %vm383_vm3, %v609_v5, %v611_v43 }
 0x169   : > { %v738_v40 = vsel %vm510_vm5, %v730_v3, %v617_v8  ;;  %v736_v26 = vsel %vm510_vm5, %v728_v39, %v616_v62  ;;  %v573_v17 = vpop.permute.xlu2 %572 }
 0x16a   : > { %829 = vrot.lane.b32.xlu0 %v738_v40, %s2621_s20  ;;  %827 = vrot.lane.b32.xlu2 %v736_v26, %s2621_s20  ;;  %v726_v28 = vsel %vm492_vm2, %v2729_v42, %v573_v17  ;;  %v576_v30 = vsel %vm339_vm0, %v2907_v49, %v573_v17  ;;  %v745_v49 = vsel %vm492_vm2, %v2921_v60, %v2905_v48 }
 0x16b   : > { %v724_v34 = vsel %vm492_vm2, %v2727_v41, %v576_v30  ;;  %v756_v41 = vsel %vm501_vm4, %v745_v49, %v2925_v7  ;;  %v716_v48 = vsel %vm488_vm10, %v2935_v20, %v2923_v6  ;;  %v655_v7 = vsel %vm423_vm6, %v2927_v50, %v651_v19 }
 0x16c   : > { %v764_v46 = vsel %vm510_vm5, %v756_v41, %v2933_v44  ;;  %v718_v50 = vsel %vm488_vm10, %v2929_v13, %v2937_v15 }
 0x16f   : > { %v653_v22 = vpop.permute.xlu0 %652  ;;  %v632_v4 = vpop.permute.xlu1 %631 }
 0x170   : > { %v656_v25 = vsel %vm423_vm6, %v651_v19, %v653_v22  ;;  %v634_v38 = vsel %vm401_vm9, %v2917_v55, %v632_v4 }
 0x171   : > { %v754_v0 = vsel %vm492_vm2, %v632_v4, %v656_v25  ;;  %v751_v44 = vsel %vm492_vm2, %v634_v38, %v655_v7 }
 0x172   : > { %837 = vrot.lane.b32.xlu2 %v766_v63, %s2621_s20 }
 0x177   : > { %v672_v23 = vpop.permute.xlu1 %671  ;;  %v693_v9 = vpop.permute.xlu0 %692 }
 0x178   : > { %v677_v57 = vsel %vm445_vm7, %v672_v23, %v674_v10  ;;  %v676_v60 = vsel %vm445_vm7, %v2915_v54, %v672_v23  ;;  %v697_v55 = vsel %vm467_vm8, %v2931_v14, %v693_v9  ;;  %v717_v54 = vsel %vm488_vm10, %v2923_v6, %v2929_v13  ;;  %v3079_v13 = vld [vmem:[%s3893_s1] sm:$0x3f] }
 0x179   : > { %v762_v16 = vsel %vm501_vm4, %v754_v0, %v677_v57  ;;  %v760_v51 = vsel %vm501_vm4, %v751_v44, %v676_v60  ;;  %v3086_v39 = vperm.slane %v3079_v13, 0  ;;  %v3089_v40 = vperm.slane %v3079_v13, 1 }
 0x17a   : > { %v768_v52 = vsel %vm510_vm5, %v760_v51, %v697_v55  ;;  %v3095_v21 = vperm.slane %v3079_v13, 2 }
 0x17f   : > { %v695_v11 = vpop.permute.xlu1 %694  ;;  %v594_v29 = vpop.permute.xlu0 %593 }
 0x180   : > { %v698_v1 = vsel %vm467_vm8, %v693_v9, %v695_v11  ;;  %v597_v31 = vsel %vm361_vm1, %v2948_v32, %v594_v29  ;;  %v734_v33 = vsel %vm501_vm4, %v726_v28, %v594_v29  ;;  %v867_v32 = vld [vmem:[%s3895_s3 + $0x8] sm:$0xff] }
 0x181   : > { %v770_v24 = vsel %vm510_vm5, %v762_v16, %v698_v1  ;;  %v732_v42 = vsel %vm501_vm4, %v724_v34, %v597_v31 }
 0x182   : > { %841 = vrot.lane.b32.xlu2 %v770_v24, %s2621_s20 }
 0x187   : > { %v615_v35 = vpop.permute.xlu1 %614 }
 0x188   : > { %v618_v36 = vsel %vm383_vm3, %v613_v2, %v615_v35  ;;  %v742_v43 = vsel %vm510_vm5, %v734_v33, %v615_v35 }
 0x189   : > { %833 = vrot.lane.b32.xlu1 %v742_v43, %s2621_s20  ;;  %v740_v45 = vsel %vm510_vm5, %v732_v42, %v618_v36 }
 0x18a   : > { %843 = vrot.lane.b32.xlu2 %v2935_v20, %s2621_s20  ;;  %831 = vrot.lane.b32.xlu0 %v740_v45, %s2621_s20 }
 0x191   : > { %835 = vrot.lane.b32.xlu1 %v764_v46, %s2621_s20 }
 0x192   : > { %875 = vperm.xlu2 %2586, %v867_v32   ;;  %845 = vrot.lane.b32.xlu0 %v716_v48, %s2621_s20 }
 0x199   : > { %839 = vrot.lane.b32.xlu1 %v768_v52, %s2621_s20 }
 0x19a   : > { %847 = vrot.lane.b32.xlu0 %v717_v54, %s2621_s20 }
 0x1a1   : > { %849 = vrot.lane.b32.xlu1 %v718_v50, %s2621_s20 }
 0x1a2   : > { %1093 = vrot.lane.b32.xlu0 %v2997_v56, %s2614_s13 }
 0x1aa   : > { %1082 = vrot.lane.b32.xlu0 %v2997_v56, %s2613_s12 }
 0x1c4   : > { %v828_v20 = vpop.permute.xlu2 %827 }
 0x1cc   : > { %v3066_v14 = vpop.permute.xlu2 %837 }
 0x1dc   : > { %v3068_v58 = vpop.permute.xlu2 %841  ;;  %v830_v4 = vpop.permute.xlu0 %829 }
 0x1dd   : > { %v851_v46 = vsel %vm803_vm11, %v828_v20, %v830_v4 }
 0x1e2   : > { %v3070_v59 = vpop.f32.mrf.mxu0  ;;  %v3072_v61 = vpop.f32.mrf.mxu1 }
 0x1e4   : > { %v844_v2 = vpop.permute.xlu2 %843 }
 0x1e9   : > { %v3074_v5 = vpop.f32.mrf.mxu2 }
 0x1ea   : > { %v916_v6 = vpop.f32.mrf.mxu0  ;;  %v930_v8 = vpop.f32.mrf.mxu1 }
 0x1ec   : > { %v3081_v15 = vpop.permute.xlu2 %875 }
 0x1ed   : > { %v917_v62 = vadd.f32 %v916_v6, %v3081_v15  ;;  %v931_v3 = vadd.f32 %v930_v8, %v3081_v15 }
 0x1ef   : > { %v995_v26 = vmax.f32 %v917_v62, 0.0  ;;  %v996_v27 = vmax.f32 %v931_v3, 0.0 }
 0x1f1   : > { %v944_v12 = vpop.f32.mrf.mxu2  ;;  %v1020_v47 = vmul.f32 %v3086_v39, %v995_v26  ;;  %v1021_v19 = vmul.f32 %v3089_v40, %v996_v27 }
 0x1f2   : > { %v945_v18 = vadd.f32 %v944_v12, %v3081_v15 }
 0x1f3   : > { %v1034_v22 = vpack.c.bf16 %v1021_v19, %v1020_v47 }
 0x1f4   : > { %v997_v63 = vmax.f32 %v945_v18, 0.0  ;;  %v3189_v18 = vperm.slane %v3079_v13, 3 }
 0x1f5   : > { %v1040_v10 = vunpack.c.l.b16 %v1034_v22  ;;  %v3099_v57 = vunpack.c.h.b16 %v1034_v22 }
 0x1f6   : > { %v1022_v23 = vmul.f32 %v3095_v21, %v997_v63 }
 0x1f7   : > { %v1045_v9 = vpack.c.b16 %v1040_v10, %v2993_v53  ;;  %v3103_v1 = vpack.c.b16 %v1040_v10, %v1040_v10 }
 0x1f8   : > { %v1035_v25 = vpack.c.bf16 %v1022_v23, %v1022_v23 }
 0x1f9   : > { %1051 = vst [vmem:[#allocation2] sm:$0xff] %v1045_v9  ;;  %1106 = vrot.lane.b32.xlu2 %v3103_v1, %s2615_s14  ;;  %1095 = vrot.lane.b32.xlu1 %v3103_v1, %s2614_s13 }
 0x1fa   : > { %v3101_v0 = vunpack.c.l.b16 %v1035_v25 }
 0x1fb   : > { %v834_v11 = vpop.permute.xlu1 %833 }
 0x1fc   : > { %v1046_v16 = vpack.c.b16 %v3101_v0, %v3099_v57  ;;  %v832_v17 = vpop.permute.xlu0 %831  ;;  %v3163_v6 = vpack.c.b16 %v3101_v0, %v3101_v0  ;;  %v3199_v0 = vperm.slane %v3079_v13, 5 }
 0x1fd   : > { %v852_v51 = vsel %vm803_vm11, %v830_v4, %v832_v17  ;;  %v853_v54 = vsel %vm803_vm11, %v832_v17, %v834_v11  ;;  %v3193_v4 = vperm.slane %v3079_v13, 4 }
 0x1fe   : > { %1052 = vst [vmem:[#allocation2 + $0x8] sm:$0xff] %v1046_v16 }
 0x201   : > { %1104 = vrot.lane.b32.xlu1 %v2997_v56, %s2615_s14 }
 0x203   : > { %v836_v24 = vpop.permute.xlu1 %835 }
 0x204   : > { %v846_v28 = vpop.permute.xlu0 %845  ;;  %v854_v43 = vsel %vm803_vm11, %v836_v24, %v3066_v14 }
 0x205   : > { %v857_v29 = vsel %vm803_vm11, %v844_v2, %v846_v28  ;;  %v1071_v30 = vld [vmem:[#allocation2 + $0xc] sm:$0xff]  ;;  %v1069_v31 = vld [vmem:[#allocation2 + $0x4] sm:$0xff] }
 0x206   : > { %v897_v33 = vsel %vm492_vm2, %v857_v29, 0  ;;  %v1132_v34 = vunpack.c.l.b16 %v1071_v30  ;;  %v1117_v35 = vunpack.c.l.b16 %v1069_v31  ;;  %v1118_v32 = vunpack.c.h.b16 %v1069_v31 }
 0x207   : > { %952 = vmatpush.bf16.msra.mxu3 %v897_v33  ;;  %v1133_v50 = vunpack.c.h.b16 %v1071_v30 }
 0x208   : > { %v1134_v36 = vpack.c.b16 %v1132_v34, %v1132_v34  ;;  %v1120_v42 = vpack.c.b16 %v1117_v35, %v1117_v35  ;;  %v1121_v48 = vpack.c.b16 %v1118_v32, %v1118_v32 }
 0x209   : > { %1084 = vrot.lane.b32.xlu1 %v3103_v1, %s2613_s12  ;;  %v1135_v20 = vpack.c.b16 %v1133_v50, %v1133_v50 }
 0x20a   : > { %1173 = vrot.lane.b32.xlu2 %v1134_v36, %s2620_s19  ;;  %1169 = vrot.lane.b32.xlu0 %v1120_v42, %s2620_s19 }
 0x20b   : > { %v840_v45 = vpop.permute.xlu1 %839  ;;  %953 = vmatpush.bf16.msra.mxu3 %v854_v43 }
 0x20c   : > { %v848_v49 = vpop.permute.xlu0 %847  ;;  %v855_v60 = vsel %vm803_vm11, %v3066_v14, %v840_v45  ;;  %v856_v52 = vsel %vm803_vm11, %v840_v45, %v3068_v58  ;;  %v1070_v14 = vld [vmem:[#allocation2 + $0xc] sm:$0xf] }
 0x20d   : > { %v858_v41 = vsel %vm803_vm11, %v846_v28, %v848_v49  ;;  %v1119_v58 = vunpack.c.l.b16 %v1070_v14 }
 0x20e   : > { %v900_v38 = vsel %vm492_vm2, %v858_v41, 0 }
 0x20f   : > { %954 = vmatpush.bf16.msra.mxu3 %v851_v46  ;;  %966 = vmatpush.bf16.msrb.mxu0 %v900_v38  ;;  %v1122_v2 = vpack.c.b16 %v1119_v58, %v1119_v58 }
 0x211   : > { %1171 = vrot.lane.b32.xlu1 %v1121_v48, %s2620_s19 }
 0x212   : > { %2543 = vmatmul.msk.bf16.vlgmr.msra.gmra.mxu3 %vm883_vm12, %v2956_v37  ;;  %1151 = vrot.lane.b32.xlu2 %v1134_v36, %s2618_s17 }
 0x213   : > { %v850_v7 = vpop.permute.xlu1 %849  ;;  %967 = vmatpush.bf16.msrb.mxu0 %v855_v60  ;;  %1147 = vrot.lane.b32.xlu0 %v1120_v42, %s2618_s17 }
 0x214   : > { %v859_v44 = vsel %vm803_vm11, %v848_v49, %v850_v7  ;;  %v3186_v12 = vpop.permute.xlu0 %1093 }
 0x215   : > { %v903_v55 = vsel %vm492_vm2, %v859_v44, 0 }
 0x216   : > { %980 = vmatpush.bf16.msrb.mxu1 %v903_v55 }
 0x217   : > { %968 = vmatpush.bf16.msrb.mxu0 %v852_v51 }
 0x219   : > { %1149 = vrot.lane.b32.xlu1 %v1121_v48, %s2618_s17 }
 0x21a   : > { %2544 = vmatmul.msk.bf16.vlgmr.msrb.gmra.mxu0 %vm883_vm12, %v2956_v37  ;;  %981 = vmatpush.bf16.msrb.mxu1 %v856_v52 }
 0x21b   : > { %1162 = vrot.lane.b32.xlu2 %v1134_v36, %s2619_s18  ;;  %1158 = vrot.lane.b32.xlu0 %v1120_v42, %s2619_s18 }
 0x21c   : > { %v3201_v16 = vpop.permute.xlu0 %1082 }
 0x21e   : > { %982 = vmatpush.bf16.msrb.mxu1 %v853_v54 }
 0x221   : > { %2545 = vmatmul.msk.bf16.vlgmr.msrb.gmra.mxu1 %vm883_vm12, %v2956_v37  ;;  %1160 = vrot.lane.b32.xlu1 %v1121_v48, %s2619_s18  ;;  %v3159_v37 = vpack.c.b16 %v3099_v57, %v3099_v57 }
 0x223   : > { %1125 = vrot.lane.b32.xlu2 %v1121_v48, %s2616_s15  ;;  %1175 = vrot.lane.b32.xlu0 %v1135_v20, %s2620_s19 }
 0x229   : > { %1123 = vrot.lane.b32.xlu1 %v1120_v42, %s2616_s15 }
 0x22b   : > { %1138 = vrot.lane.b32.xlu2 %v1121_v48, %s2617_s16  ;;  %1127 = vrot.lane.b32.xlu0 %v1122_v2, %s2616_s15 }
 0x231   : > { %1136 = vrot.lane.b32.xlu1 %v1120_v42, %s2617_s16 }
 0x233   : > { %1164 = vrot.lane.b32.xlu2 %v1135_v20, %s2619_s18  ;;  %1140 = vrot.lane.b32.xlu0 %v1134_v36, %s2617_s16 }
 0x239   : > { %1153 = vrot.lane.b32.xlu1 %v1135_v20, %s2618_s17 }
 0x23b   : > { %1097 = vrot.lane.b32.xlu2 %v3159_v37, %s2614_s13  ;;  %1099 = vrot.lane.b32.xlu0 %v3163_v6, %s2614_s13 }
 0x241   : > { %1110 = vrot.lane.b32.xlu1 %v3163_v6, %s2615_s14 }
 0x243   : > { %1142 = vrot.lane.b32.xlu2 %v1135_v20, %s2617_s16  ;;  %1108 = vrot.lane.b32.xlu0 %v3159_v37, %s2615_s14 }
 0x24b   : > { %1086 = vrot.lane.b32.xlu2 %v3159_v37, %s2613_s12  ;;  %1088 = vrot.lane.b32.xlu0 %v3163_v6, %s2613_s12 }
 0x26b   : > { %v3209_v13 = vpop.permute.xlu1 %1095 }
 0x273   : > { %v1105_v38 = vpop.permute.xlu1 %1104 }
 0x27b   : > { %v3225_v55 = vpop.permute.xlu1 %1084 }
 0x27c   : > { %v3205_v34 = vpop.permute.xlu0 %1169 }
 0x283   : > { %v1172_v54 = vpop.permute.xlu1 %1171 }
 0x295   : > { %v3179_v8 = vpop.f32.mrf.mxu3 }
 0x297   : > { %v3181_v62 = vpop.f32.mrf.mxu0 }
 0x29d   : > { %v958_v3 = vpop.f32.mrf.mxu3 }
 0x29e   : > { %v959_v26 = vadd.f32 %v958_v3, %v3081_v15  ;;  %v3184_v27 = vpop.f32.mrf.mxu1  ;;  %v1150_v3 = vpop.permute.xlu1 %1149 }
 0x29f   : > { %v972_v47 = vpop.f32.mrf.mxu0 }
 0x2a0   : > { %v998_v19 = vmax.f32 %v959_v26, 0.0  ;;  %v973_v22 = vadd.f32 %v972_v47, %v3081_v15 }
 0x2a2   : > { %v999_v63 = vmax.f32 %v973_v22, 0.0  ;;  %v1023_v10 = vmul.f32 %v3189_v18, %v998_v19 }
 0x2a4   : > { %v1024_v23 = vmul.f32 %v3193_v4, %v999_v63 }
 0x2a6   : > { %v1036_v9 = vpack.c.bf16 %v1024_v23, %v1023_v10  ;;  %v986_v25 = vpop.f32.mrf.mxu1  ;;  %v1161_v19 = vpop.permute.xlu1 %1160  ;;  %v1090_v23 = vsel %vm339_vm0, %v3201_v16, %v3225_v55  ;;  %v1101_v16 = vsel %vm361_vm1, %v3186_v12, %v3209_v13 }
 0x2a7   : > { %v987_v57 = vadd.f32 %v986_v25, %v3081_v15  ;;  %v3207_v15 = vpop.permute.xlu2 %1106 }
 0x2a8   : > { %v1056_v11 = vunpack.c.l.b16 %v1036_v9  ;;  %v1057_v30 = vunpack.c.h.b16 %v1036_v9 }
 0x2a9   : > { %v1000_v17 = vmax.f32 %v987_v57, 0.0 }
 0x2aa   : > { %v1059_v24 = vpack.c.b16 %v1056_v11, %v2993_v53  ;;  %v3211_v53 = vpop.permute.xlu0 %1147  ;;  %v3247_v22 = vpack.c.b16 %v1057_v30, %v1057_v30  ;;  %v3249_v63 = vpack.c.b16 %v1056_v11, %v1056_v11  ;;  %v1182_v11 = vsel %vm501_vm4, %v2997_v56, %v1090_v23 }
 0x2ab   : > { %v1025_v28 = vmul.f32 %v3199_v0, %v1000_v17  ;;  %v1177_v17 = vsel %vm488_vm10, %v3205_v34, %v1172_v54 }
 0x2ac   : > { %1063 = vst [vmem:[#allocation2 + $0x14] sm:$0xff] %v1059_v24 }
 0x2ad   : > { %v1037_v29 = vpack.c.bf16 %v1025_v28, %v1025_v28  ;;  %v1112_v28 = vsel %vm383_vm3, %v1105_v38, %v3207_v15 }
 0x2ae   : > { %v1124_v25 = vpop.permute.xlu1 %1123 }
 0x2af   : > { %v1058_v31 = vunpack.c.l.b16 %v1037_v29  ;;  %v3216_v46 = vpop.permute.xlu2 %1173 }
 0x2b1   : > { %v1060_v33 = vpack.c.b16 %v1058_v31, %v1057_v30  ;;  %v3259_v57 = vpack.c.b16 %v1058_v31, %v1058_v31 }
 0x2b2   : > { %v3218_v7 = vpop.permute.xlu0 %1158 }
 0x2b3   : > { %1064 = vst [vmem:[#allocation2 + $0x1c] sm:$0xff] %v1060_v33  ;;  %v1194_v33 = vsel %vm501_vm4, %v1101_v16, %v1112_v28  ;;  %v1218_v12 = vsel %vm501_vm4, %v3211_v53, %v3218_v7 }
 0x2b6   : > { %v1137_v30 = vpop.permute.xlu1 %1136 }
 0x2b7   : > { %v3223_v44 = vpop.permute.xlu2 %1151  ;;  %v1206_v31 = vsel %vm501_vm4, %v1124_v25, %v1137_v30 }
 0x2ba   : > { %v1233_v35 = vld [vmem:[#allocation2 + $0x20] sm:$0xff]  ;;  %v1232_v36 = vld [vmem:[#allocation2 + $0x18] sm:$0xff]  ;;  %v1176_v51 = vpop.permute.xlu0 %1175 }
 0x2bb   : > { %v1297_v43 = vunpack.c.l.b16 %v1233_v35  ;;  %v1296_v42 = vunpack.c.h.b16 %v1232_v36  ;;  %v1295_v45 = vunpack.c.l.b16 %v1232_v36  ;;  %v1298_v48 = vunpack.c.h.b16 %v1233_v35  ;;  %v1231_v50 = vld [vmem:[#allocation2 + $0x20] sm:$0xf] }
 0x2bc   : > { %v1281_v20 = vunpack.c.l.b16 %v1231_v50 }
 0x2bd   : > { %v1301_v49 = vpack.c.b16 %v1297_v43, %v1297_v43  ;;  %v1300_v41 = vpack.c.b16 %v1296_v42, %v1296_v42  ;;  %v1299_v32 = vpack.c.b16 %v1295_v45, %v1295_v45  ;;  %v1302_v60 = vpack.c.b16 %v1298_v48, %v1298_v48 }
 0x2be   : > { %v1284_v58 = vpack.c.b16 %v1281_v20, %v1281_v20  ;;  %v1178_v42 = vsel %vm488_vm10, %v1172_v54, %v3216_v46  ;;  %v1166_v45 = vsel %vm467_vm8, %v3218_v7, %v1161_v19 }
 0x2bf   : > { %1340 = vrot.lane.b32.xlu2 %v1301_v49, %s2620_s19  ;;  %1338 = vrot.lane.b32.xlu1 %v1300_v41, %s2620_s19  ;;  %v3230_v52 = vpop.permute.xlu2 %1162 }
 0x2c0   : > { %1336 = vrot.lane.b32.xlu0 %v1299_v32, %s2620_s19 }
 0x2c2   : > { %v3235_v14 = vpop.permute.xlu0 %1127 }
 0x2c7   : > { %1316 = vrot.lane.b32.xlu2 %v1300_v41, %s2618_s17  ;;  %1314 = vrot.lane.b32.xlu1 %v1299_v32, %s2618_s17  ;;  %v3237_v2 = vpop.permute.xlu2 %1125 }
 0x2c8   : > { %1342 = vrot.lane.b32.xlu0 %v1302_v60, %s2620_s19 }
 0x2ca   : > { %v3242_v26 = vpop.permute.xlu0 %1140 }
 0x2cf   : > { %1325 = vrot.lane.b32.xlu2 %v1299_v32, %s2619_s18  ;;  %1320 = vrot.lane.b32.xlu1 %v1302_v60, %s2618_s17  ;;  %v1139_v47 = vpop.permute.xlu2 %1138 }
 0x2d0   : > { %1318 = vrot.lane.b32.xlu0 %v1301_v49, %s2618_s17 }
 0x2d2   : > { %v1100_v10 = vpop.permute.xlu0 %1099 }
 0x2d7   : > { %1331 = vrot.lane.b32.xlu2 %v1302_v60, %s2619_s18  ;;  %1329 = vrot.lane.b32.xlu1 %v1301_v49, %s2619_s18  ;;  %v1165_v9 = vpop.permute.xlu2 %1164 }
 0x2d8   : > { %1327 = vrot.lane.b32.xlu0 %v1300_v41, %s2619_s18 }
 0x2da   : > { %v1109_v24 = vpop.permute.xlu0 %1108 }
 0x2df   : > { %1289 = vrot.lane.b32.xlu2 %v1284_v58, %s2616_s15  ;;  %1287 = vrot.lane.b32.xlu1 %v1300_v41, %s2616_s15  ;;  %v1098_v29 = vpop.permute.xlu2 %1097 }
 0x2e0   : > { %1285 = vrot.lane.b32.xlu0 %v1299_v32, %s2616_s15  ;;  %v1102_v16 = vsel %vm361_vm1, %v3209_v13, %v1098_v29 }
 0x2e2   : > { %v1089_v35 = vpop.permute.xlu0 %1088 }
 0x2e3   : > { %v1191_v36 = vsel %vm501_vm4, %v3163_v6, %v1089_v35  ;;  %v1156_v6 = vsel %vm445_vm7, %v1150_v3, %v3223_v44 }
 0x2e7   : > { %1307 = vrot.lane.b32.xlu2 %v1301_v49, %s2617_s16  ;;  %1305 = vrot.lane.b32.xlu1 %v1300_v41, %s2617_s16  ;;  %v1143_v43 = vpop.permute.xlu2 %1142  ;;  %v1154_v49 = vpop.permute.xlu1 %1153  ;;  %v1167_v41 = vsel %vm467_vm8, %v1161_v19, %v3230_v52 }
 0x2e8   : > { %1303 = vrot.lane.b32.xlu0 %v1299_v32, %s2617_s16  ;;  %v1179_v32 = vsel %vm488_vm10, %v3216_v46, %v1176_v51  ;;  %v1224_v48 = vsel %vm501_vm4, %v1156_v6, %v1167_v41  ;;  %v1157_v7 = vsel %vm445_vm7, %v3223_v44, %v1154_v49  ;;  %v1129_v46 = vsel %vm401_vm9, %v1124_v25, %v3237_v2 }
 0x2e9   : > { %v1144_v51 = vsel %vm423_vm6, %v1137_v30, %v1139_v47  ;;  %v1130_v44 = vsel %vm401_vm9, %v3237_v2, %v3235_v14  ;;  %v1146_v23 = vsel %vm423_vm6, %v3242_v26, %v1143_v43 }
 0x2ea   : > { %v1209_v58 = vsel %vm501_vm4, %v1129_v46, %v1144_v51 }
 0x2ef   : > { %1259 = vrot.lane.b32.xlu2 %v3247_v22, %s2614_s13  ;;  %1257 = vrot.lane.b32.xlu1 %v3249_v63, %s2614_s13  ;;  %v1111_v54 = vpop.permute.xlu1 %1110 }
 0x2f0   : > { %1309 = vrot.lane.b32.xlu0 %v1302_v60, %s2617_s16  ;;  %v1168_v60 = vsel %vm467_vm8, %v3230_v52, %v1165_v9  ;;  %v1203_v50 = vsel %vm501_vm4, %v1100_v10, %v1111_v54  ;;  %v1114_v19 = vsel %vm383_vm3, %v1109_v24, %v1111_v54  ;;  %v1103_v9 = vsel %vm361_vm1, %v1098_v29, %v1100_v10 }
 0x2f1   : > { %v1227_v20 = vsel %vm501_vm4, %v1157_v7, %v1168_v60 }
 0x2f7   : > { %1411 = vrot.lane.b32.xlu1 %v1182_v11, %s2621_s20  ;;  %1445 = vrot.lane.b32.xlu2 %v1177_v17, %s2621_s20  ;;  %v1200_v11 = vsel %vm501_vm4, %v1103_v9, %v1114_v19  ;;  %v1215_v17 = vsel %vm501_vm4, %v3235_v14, %v1146_v23 }
 0x2f8   : > { %1261 = vrot.lane.b32.xlu0 %v3259_v57, %s2614_s13 }
 0x2ff   : > { %1427 = vrot.lane.b32.xlu2 %v1206_v31, %s2621_s20  ;;  %1443 = vrot.lane.b32.xlu1 %v3205_v34, %s2621_s20  ;;  %v1155_v34 = vsel %vm445_vm7, %v3211_v53, %v1150_v3  ;;  %v1087_v53 = vpop.permute.xlu2 %1086  ;;  %v1145_v3 = vsel %vm423_vm6, %v1139_v47, %v3242_v26  ;;  %v1113_v47 = vsel %vm383_vm3, %v3207_v15, %v1109_v24 }
 0x300   : > { %1419 = vrot.lane.b32.xlu0 %v1194_v33, %s2621_s20  ;;  %v1221_v38 = vsel %vm501_vm4, %v1155_v34, %v1166_v45  ;;  %v1212_v25 = vsel %vm501_vm4, %v1130_v44, %v1145_v3  ;;  %v1091_v26 = vsel %vm339_vm0, %v3225_v55, %v1087_v53  ;;  %v1092_v10 = vsel %vm339_vm0, %v1087_v53, %v1089_v35 }
 0x301   : > { %v1197_v14 = vsel %vm501_vm4, %v1102_v16, %v1113_v47  ;;  %v1185_v28 = vsel %vm501_vm4, %v3103_v1, %v1091_v26  ;;  %v1188_v55 = vsel %vm501_vm4, %v3159_v37, %v1092_v10 }
 0x307   : > { %1435 = vrot.lane.b32.xlu1 %v1218_v12, %s2621_s20  ;;  %1417 = vrot.lane.b32.xlu2 %v1191_v36, %s2621_s20 }
 0x308   : > { %1447 = vrot.lane.b32.xlu0 %v1178_v42, %s2621_s20 }
 0x30f   : > { %1449 = vrot.lane.b32.xlu1 %v1179_v32, %s2621_s20  ;;  %1437 = vrot.lane.b32.xlu2 %v1221_v38, %s2621_s20 }
 0x310   : > { %1439 = vrot.lane.b32.xlu0 %v1224_v48, %s2621_s20 }
 0x317   : > { %1425 = vrot.lane.b32.xlu1 %v1203_v50, %s2621_s20  ;;  %1441 = vrot.lane.b32.xlu2 %v1227_v20, %s2621_s20 }
 0x318   : > { %1429 = vrot.lane.b32.xlu0 %v1209_v58, %s2621_s20 }
 0x319   : > { %v1341_v52 = vpop.permute.xlu2 %1340 }
 0x31f   : > { %1431 = vrot.lane.b32.xlu1 %v1212_v25, %s2621_s20  ;;  %1423 = vrot.lane.b32.xlu2 %v1200_v11, %s2621_s20 }
 0x320   : > { %1433 = vrot.lane.b32.xlu0 %v1215_v17, %s2621_s20 }
 0x321   : > { %v3334_v2 = vpop.permute.xlu2 %1316 }
 0x327   : > { %1421 = vrot.lane.b32.xlu1 %v1197_v14, %s2621_s20  ;;  %1413 = vrot.lane.b32.xlu2 %v1185_v28, %s2621_s20 }
 0x328   : > { %1415 = vrot.lane.b32.xlu0 %v1188_v55, %s2621_s20 }
 0x329   : > { %v1326_v15 = vpop.permute.xlu2 %1325 }
 0x32f   : > { %1268 = vrot.lane.b32.xlu1 %v3249_v63, %s2615_s14  ;;  %1270 = vrot.lane.b32.xlu2 %v3247_v22, %s2615_s14 }
 0x330   : > { %1272 = vrot.lane.b32.xlu0 %v3259_v57, %s2615_s14 }
 0x331   : > { %v1339_v1 = vpop.permute.xlu1 %1338  ;;  %v1332_v13 = vpop.permute.xlu2 %1331 }
 0x332   : > { %v1337_v24 = vpop.permute.xlu0 %1336  ;;  %v1345_v12 = vsel %vm488_vm10, %v1339_v1, %v1341_v52 }
 0x333   : > { %v1344_v49 = vsel %vm488_vm10, %v1337_v24, %v1339_v1 }
 0x337   : > { %1246 = vrot.lane.b32.xlu1 %v3249_v63, %s2613_s12  ;;  %1248 = vrot.lane.b32.xlu2 %v3247_v22, %s2613_s12 }
 0x338   : > { %1250 = vrot.lane.b32.xlu0 %v3259_v57, %s2613_s12 }
 0x339   : > { %v1290_v37 = vpop.permute.xlu2 %1289  ;;  %v1315_v29 = vpop.permute.xlu1 %1314 }
 0x33a   : > { %v1343_v30 = vpop.permute.xlu0 %1342  ;;  %v1385_v45 = vsel %vm501_vm4, %v1315_v29, %v1326_v15  ;;  %v1322_v38 = vsel %vm445_vm7, %v1315_v29, %v3334_v2 }
 0x33b   : > { %v1346_v36 = vsel %vm488_vm10, %v1341_v52, %v1343_v30 }
 0x33f   : > { %1255 = vrot.lane.b32.xlu1 %v2997_v56, %s2614_s13  ;;  %1266 = vrot.lane.b32.xlu2 %v2997_v56, %s2615_s14 }
 0x340   : > { %1244 = vrot.lane.b32.xlu0 %v2997_v56, %s2613_s12 }
 0x341   : > { %v1321_v31 = vpop.permute.xlu1 %1320  ;;  %v1308_v33 = vpop.permute.xlu2 %1307 }
 0x342   : > { %v3369_v35 = vpop.permute.xlu0 %1318 }
 0x343   : > { %v1324_v20 = vsel %vm445_vm7, %v3369_v35, %v1321_v31 }
 0x347   : > { %1530 = vrot.lane.b32.xlu2 %v1345_v12, %s2621_s20  ;;  %1526 = vrot.lane.b32.xlu1 %v1337_v24, %s2621_s20 }
 0x348   : > { %1532 = vrot.lane.b32.xlu0 %v1346_v36, %s2621_s20 }
 0x349   : > { %v3376_v43 = vpop.permute.xlu1 %1329  ;;  %v3380_v34 = vpop.permute.xlu2 %1259 }
 0x34a   : > { %v3378_v42 = vpop.permute.xlu0 %1327  ;;  %v1335_v51 = vsel %vm467_vm8, %v3376_v43, %v1332_v13 }
 0x34b   : > { %v1333_v32 = vsel %vm467_vm8, %v1326_v15, %v3378_v42  ;;  %v1394_v44 = vsel %vm501_vm4, %v1324_v20, %v1335_v51 }
 0x34c   : > { %v1388_v53 = vsel %vm501_vm4, %v1322_v38, %v1333_v32 }
 0x34f   : > { %1518 = vrot.lane.b32.xlu2 %v1385_v45, %s2621_s20  ;;  %1528 = vrot.lane.b32.xlu1 %v1344_v49, %s2621_s20 }
 0x351   : > { %v3386_v6 = vpop.permute.xlu1 %1287  ;;  %v1446_v48 = vpop.permute.xlu2 %1445 }
 0x352   : > { %v3388_v41 = vpop.permute.xlu0 %1285  ;;  %v1292_v9 = vsel %vm401_vm9, %v3386_v6, %v1290_v37 }
 0x357   : > { %1520 = vrot.lane.b32.xlu1 %v1388_v53, %s2621_s20 }
 0x359   : > { %v3396_v60 = vpop.permute.xlu1 %1305  ;;  %v1428_v54 = vpop.permute.xlu2 %1427 }
 0x35a   : > { %v3398_v7 = vpop.permute.xlu0 %1303  ;;  %v1312_v19 = vsel %vm423_vm6, %v3396_v60, %v1308_v33 }
 0x35b   : > { %v1373_v46 = vsel %vm501_vm4, %v3388_v41, %v3398_v7  ;;  %v1379_v17 = vsel %vm501_vm4, %v1292_v9, %v1312_v19 }
 0x35c   : > { %1510 = vrot.lane.b32.xlu0 %v1373_v46, %s2621_s20 }
 0x361   : > { %v3406_v50 = vpop.permute.xlu1 %1257  ;;  %v1418_v25 = vpop.permute.xlu2 %1417 }
 0x362   : > { %v1310_v58 = vpop.permute.xlu0 %1309 }
 0x363   : > { %v1313_v52 = vsel %vm423_vm6, %v1308_v33, %v1310_v58 }
 0x364   : > { %1524 = vrot.lane.b32.xlu0 %v1394_v44, %s2621_s20  ;;  %v1382_v3 = vsel %vm501_vm4, %v1290_v37, %v1313_v52 }
 0x365   : > { %1516 = vrot.lane.b32.xlu1 %v1382_v3, %s2621_s20 }
 0x369   : > { %v1412_v23 = vpop.permute.xlu1 %1411  ;;  %v1438_v14 = vpop.permute.xlu2 %1437 }
 0x36a   : > { %v3419_v11 = vpop.permute.xlu0 %1261 }
 0x36c   : > { %1514 = vrot.lane.b32.xlu0 %v1379_v17, %s2621_s20 }
 0x371   : > { %v1444_v26 = vpop.permute.xlu1 %1443  ;;  %v1442_v24 = vpop.permute.xlu2 %1441 }
 0x372   : > { %v1420_v47 = vpop.permute.xlu0 %1419  ;;  %v1463_v10 = vsel %vm803_vm11, %v1444_v26, %v1446_v48  ;;  %v3444_v26 = vld [vmem:[%s3898_s6] sm:$0x3] }
 0x373   : > { %v1572_v16 = vsel %vm501_vm4, %v1463_v10, 0 }
 0x374   : > { %1592 = vmatpush.bf16.msrb.mxu2 %v1572_v16  ;;  %v1265_v16 = vsel %vm361_vm1, %v3380_v34, %v3419_v11 }
 0x379   : > { %v1436_v28 = vpop.permute.xlu1 %1435  ;;  %v1424_v36 = vpop.permute.xlu2 %1423 }
 0x37a   : > { %v1448_v55 = vpop.permute.xlu0 %1447  ;;  %v1460_v15 = vsel %vm803_vm11, %v1436_v28, %v1438_v14 }
 0x37b   : > { %1593 = vmatpush.bf16.msrb.mxu2 %v1460_v15  ;;  %v1464_v1 = vsel %vm803_vm11, %v1446_v48, %v1448_v55 }
 0x37c   : > { %v1575_v13 = vsel %vm501_vm4, %v1464_v1, 0 }
 0x37d   : > { %1605 = vmatpush.bf16.msrb.mxu3 %v1575_v13 }
 0x381   : > { %v1450_v37 = vpop.permute.xlu1 %1449  ;;  %v1414_v48 = vpop.permute.xlu2 %1413 }
 0x382   : > { %v1465_v29 = vsel %vm803_vm11, %v1448_v55, %v1450_v37  ;;  %v1440_v30 = vpop.permute.xlu0 %1439  ;;  %v1451_v9 = vsel %vm803_vm11, %v1412_v23, %v1414_v48 }
 0x383   : > { %v1578_v31 = vsel %vm501_vm4, %v1465_v29, 0  ;;  %v1461_v33 = vsel %vm803_vm11, %v1438_v14, %v1440_v30  ;;  %v1462_v12 = vsel %vm803_vm11, %v1440_v30, %v1442_v24 }
 0x384   : > { %1606 = vmatpush.bf16.msrb.mxu3 %v1461_v33  ;;  %1618 = vmatpush.bf16.msra.mxu0 %v1578_v31 }
 0x388   : > { %1619 = vmatpush.bf16.msra.mxu0 %v1462_v12 }
 0x389   : > { %v1426_v45 = vpop.permute.xlu1 %1425  ;;  %v1271_v19 = vpop.permute.xlu2 %1270 }
 0x38a   : > { %v1430_v49 = vpop.permute.xlu0 %1429  ;;  %v1456_v20 = vsel %vm803_vm11, %v1424_v36, %v1426_v45 }
 0x38b   : > { %v1457_v32 = vsel %vm803_vm11, %v1428_v54, %v1430_v49 }
 0x38c   : > { %1594 = vmatpush.bf16.msrb.mxu2 %v1457_v32 }
 0x391   : > { %v1432_v38 = vpop.permute.xlu1 %1431  ;;  %v1249_v1 = vpop.permute.xlu2 %1248 }
 0x392   : > { %v1434_v53 = vpop.permute.xlu0 %1433  ;;  %v1458_v46 = vsel %vm803_vm11, %v1430_v49, %v1432_v38 }
 0x393   : > { %1607 = vmatpush.bf16.msrb.mxu3 %v1458_v46  ;;  %v1459_v51 = vsel %vm803_vm11, %v1432_v38, %v1434_v53 }
 0x394   : > { %1620 = vmatpush.bf16.msra.mxu0 %v1459_v51 }
 0x398   : > { %1621 = vmatpush.bf16.msra.mxu0 %v1456_v20 }
 0x399   : > { %v1422_v58 = vpop.permute.xlu1 %1421 }
 0x39a   : > { %v1416_v52 = vpop.permute.xlu0 %1415  ;;  %v1454_v44 = vsel %vm803_vm11, %v1420_v47, %v1422_v58  ;;  %v1455_v3 = vsel %vm803_vm11, %v1422_v58, %v1424_v36 }
 0x39b   : > { %1595 = vmatpush.bf16.msrb.mxu2 %v1454_v44  ;;  %1608 = vmatpush.bf16.msrb.mxu3 %v1455_v3  ;;  %v1453_v54 = vsel %vm803_vm11, %v1416_v52, %v1418_v25  ;;  %v1452_v17 = vsel %vm803_vm11, %v1414_v48, %v1416_v52  ;;  %v1264_v25 = vsel %vm361_vm1, %v3406_v50, %v3380_v34 }
 0x39c   : > { %1622 = vmatpush.bf16.msra.mxu0 %v1453_v54  ;;  %v1334_v34 = vsel %vm467_vm8, %v3378_v42, %v3376_v43 }
 0x39f   : > { %1596 = vmatpush.bf16.msrb.mxu2 %v1451_v9  ;;  %1609 = vmatpush.bf16.msrb.mxu3 %v1452_v17  ;;  %v1692_v9 = vld [vmem:[%s2682_s11 + $0xc] sm:$0x3f] }
 0x3a0   : > { %2548 = vmatmul.msk.bf16.vlgmr.msra.gmra.mxu0 %vm1567_vm13, %v3444_v26  ;;  %v1694_v17 = vunpack.c.h.bf16 %v1692_v9 }
 0x3a1   : > { %v1269_v47 = vpop.permute.xlu1 %1268 }
 0x3a2   : > { %v1275_v23 = vsel %vm383_vm3, %v1269_v47, %v1271_v19  ;;  %v1273_v10 = vpop.permute.xlu0 %1272  ;;  %2546 = vmatmul.msk.bf16.vlgmr.msrb.gmra.mxu2 %vm1567_vm13, %v3444_v26  ;;  %2547 = vmatmul.msk.bf16.vlgmr.msrb.gmra.mxu3 %vm1567_vm13, %v3444_v26 }
 0x3a3   : > { %v1276_v14 = vsel %vm383_vm3, %v1271_v19, %v1273_v10  ;;  %v1370_v28 = vsel %vm501_vm4, %v3419_v11, %v1273_v10  ;;  %v1364_v55 = vsel %vm501_vm4, %v1264_v25, %v1275_v23  ;;  %v1323_v11 = vsel %vm445_vm7, %v3334_v2, %v3369_v35  ;;  %v1267_v35 = vpop.permute.xlu2 %1266  ;;  %v1683_v10 = vld.sshfl [vmem:[#allocation1 + $0x10] sm:$0xff pattern:$0x75316420] }
 0x3a4   : > { %1508 = vrot.lane.b32.xlu2 %v1370_v28, %s2621_s20  ;;  %1504 = vrot.lane.b32.xlu0 %v1364_v55, %s2621_s20  ;;  %v1367_v15 = vsel %vm501_vm4, %v1265_v16, %v1276_v14  ;;  %v1391_v30 = vsel %vm501_vm4, %v1323_v11, %v1334_v34  ;;  %v1311_v2 = vsel %vm423_vm6, %v3398_v7, %v3396_v60  ;;  %v1681_v14 = vld.sshfl [vmem:[#allocation1] sm:$0xff pattern:$0x75316420]  ;;  %v1682_v28 = vld.sshfl [vmem:[#allocation1 + $0x8] sm:$0xff pattern:$0x75316420] }
 0x3a5   : > { %1506 = vrot.lane.b32.xlu1 %v1367_v15, %s2621_s20  ;;  %v1274_v42 = vsel %vm383_vm3, %v1267_v35, %v1269_v47  ;;  %v1693_v47 = vunpack.c.l.bf16 %v1692_v9  ;;  %1699 = vst [vmem:[#allocation1 + $0x10] ss:$2 sm:$0xff] %v1694_v17 }
 0x3a7   : > { %1697 = vst [vmem:[#allocation1] ss:$2 sm:$0xff] %v1693_v47 }
 0x3a9   : > { %v1247_v13 = vpop.permute.xlu1 %1246 }
 0x3aa   : > { %v1253_v24 = vsel %vm339_vm0, %v1247_v13, %v1249_v1  ;;  %v1251_v37 = vpop.permute.xlu0 %1250 }
 0x3ab   : > { %v1358_v29 = vsel %vm501_vm4, %v3259_v57, %v1251_v37  ;;  %v1352_v31 = vsel %vm501_vm4, %v3249_v63, %v1253_v24  ;;  %v1561_v57 = vld [vmem:[%s3899_s7] sm:$0xf]  ;;  %v1291_v63 = vsel %vm401_vm9, %v3388_v41, %v3386_v6  ;;  %v1254_v7 = vsel %vm339_vm0, %v1249_v1, %v1251_v37  ;;  %v1531_v49 = vpop.permute.xlu2 %1530 }
 0x3ac   : > { %1522 = vrot.lane.b32.xlu2 %v1391_v30, %s2621_s20  ;;  %1500 = vrot.lane.b32.xlu0 %v1358_v29, %s2621_s20  ;;  %v1376_v36 = vsel %vm501_vm4, %v1291_v63, %v1311_v2 }
 0x3ad   : > { %1496 = vrot.lane.b32.xlu1 %v1352_v31, %s2621_s20 }
 0x3b1   : > { %v1256_v43 = vpop.permute.xlu1 %1255 }
 0x3b2   : > { %v1263_v33 = vsel %vm361_vm1, %v1256_v43, %v3406_v50  ;;  %v1245_v12 = vpop.permute.xlu0 %1244  ;;  %v1355_v50 = vsel %vm501_vm4, %v3247_v22, %v1254_v7 }
 0x3b3   : > { %v1361_v60 = vsel %vm501_vm4, %v1263_v33, %v1274_v42  ;;  %v1252_v38 = vsel %vm339_vm0, %v1245_v12, %v1247_v13  ;;  %v1519_v58 = vpop.permute.xlu2 %1518 }
 0x3b4   : > { %1512 = vrot.lane.b32.xlu2 %v1376_v36, %s2621_s20  ;;  %1564 = vperm.xlu0 %2587, %v1561_v57   ;;  %v1349_v22 = vsel %vm501_vm4, %v2997_v56, %v1252_v38 }
 0x3b5   : > { %1502 = vrot.lane.b32.xlu1 %v1361_v60, %s2621_s20 }
 0x3b9   : > { %v1527_v45 = vpop.permute.xlu1 %1526 }
 0x3ba   : > { %v1533_v6 = vpop.permute.xlu0 %1532 }
 0x3bb   : > { %v1548_v41 = vsel %vm803_vm11, %v1531_v49, %v1533_v6 }
 0x3bc   : > { %v1587_v32 = vsel %vm501_vm4, %v1548_v41, 0  ;;  %1498 = vrot.lane.b32.xlu2 %v1355_v50, %s2621_s20 }
 0x3bd   : > { %1657 = vmatpush.bf16.msra.mxu3 %v1587_v32 }
 0x3c1   : > { %v1529_v48 = vpop.permute.xlu1 %1528 }
 0x3c2   : > { %v1546_v53 = vsel %vm803_vm11, %v1527_v45, %v1529_v48  ;;  %v1547_v46 = vsel %vm803_vm11, %v1529_v48, %v1531_v49 }
 0x3c3   : > { %v1581_v51 = vsel %vm501_vm4, %v1546_v53, 0  ;;  %v1584_v20 = vsel %vm501_vm4, %v1547_v46, 0 }
 0x3c4   : > { %1494 = vrot.lane.b32.xlu2 %v1349_v22, %s2621_s20  ;;  %1631 = vmatpush.bf16.msra.mxu1 %v1581_v51 }
 0x3c5   : > { %1644 = vmatpush.bf16.msra.mxu2 %v1584_v20 }
 0x3c9   : > { %v1521_v52 = vpop.permute.xlu1 %1520 }
 0x3ca   : > { %v1543_v44 = vsel %vm803_vm11, %v1519_v58, %v1521_v52 }
 0x3cb   : > { %1632 = vmatpush.bf16.msra.mxu1 %v1543_v44 }
 0x3ce   : > { %v1511_v3 = vpop.permute.xlu0 %1510 }
 0x3d6   : > { %v1525_v54 = vpop.permute.xlu0 %1524 }
 0x3d7   : > { %v1517_v55 = vpop.permute.xlu1 %1516 }
 0x3de   : > { %v1515_v16 = vpop.permute.xlu0 %1514 }
 0x3df   : > { %v1542_v15 = vsel %vm803_vm11, %v1515_v16, %v1517_v55 }
 0x3fe   : > { %v1509_v19 = vpop.permute.xlu2 %1508 }
 0x406   : > { %v1523_v25 = vpop.permute.xlu2 %1522 }
 0x407   : > { %v1544_v23 = vsel %vm803_vm11, %v1521_v52, %v1523_v25  ;;  %v1545_v56 = vsel %vm803_vm11, %v1523_v25, %v1525_v54 }
 0x408   : > { %1645 = vmatpush.bf16.msra.mxu2 %v1544_v23  ;;  %1658 = vmatpush.bf16.msra.mxu3 %v1545_v56  ;;  %v3539_v23 = vld.sshfl [vmem:[#allocation1 + $0x10] sm:$0xff pattern:$0x75316420]  ;;  %v3541_v56 = vld.sshfl [vmem:[#allocation1] sm:$0xff pattern:$0x75316420] }
 0x40c   : > { %1659 = vmatpush.bf16.msra.mxu3 %v1542_v15 }
 0x40e   : > { %v1513_v1 = vpop.permute.xlu2 %1512 }
 0x40f   : > { %v1540_v34 = vsel %vm803_vm11, %v1511_v3, %v1513_v1  ;;  %v1541_v13 = vsel %vm803_vm11, %v1513_v1, %v1515_v16 }
 0x410   : > { %1633 = vmatpush.bf16.msra.mxu1 %v1540_v34  ;;  %1646 = vmatpush.bf16.msra.mxu2 %v1541_v13 }
 0x416   : > { %v1505_v11 = vpop.permute.xlu0 %1504  ;;  %v1499_v30 = vpop.permute.xlu2 %1498 }
 0x417   : > { %v1507_v24 = vpop.permute.xlu1 %1506 }
 0x418   : > { %v1538_v37 = vsel %vm803_vm11, %v1505_v11, %v1507_v24  ;;  %v1539_v29 = vsel %vm803_vm11, %v1507_v24, %v1509_v19 }
 0x419   : > { %1647 = vmatpush.bf16.msra.mxu2 %v1538_v37  ;;  %1660 = vmatpush.bf16.msra.mxu3 %v1539_v29 }
 0x41d   : > { %v1624_v2 = vpop.f32.mrf.mxu0 }
 0x41e   : > { %v1501_v31 = vpop.permute.xlu0 %1500  ;;  %v1495_v6 = vpop.permute.xlu2 %1494 }
 0x41f   : > { %v1497_v35 = vpop.permute.xlu1 %1496  ;;  %v1536_v43 = vsel %vm803_vm11, %v1499_v30, %v1501_v31 }
 0x420   : > { %v1535_v57 = vsel %vm803_vm11, %v1497_v35, %v1499_v30  ;;  %1661 = vmatpush.bf16.msra.mxu3 %v1536_v43  ;;  %v1534_v46 = vsel %vm803_vm11, %v1495_v6, %v1497_v35 }
 0x421   : > { %1648 = vmatpush.bf16.msra.mxu2 %v1535_v57 }
 0x423   : > { %2551 = vmatmul.msk.bf16.vlgmr.msra.gmra.mxu3 %vm1567_vm13, %v3444_v26 }
 0x424   : > { %2550 = vmatmul.msk.bf16.vlgmr.msra.gmra.mxu2 %vm1567_vm13, %v3444_v26 }
 0x425   : > { %v1598_v63 = vpop.f32.mrf.mxu2  ;;  %v1611_v42 = vpop.f32.mrf.mxu3 }
 0x426   : > { %v3527_v33 = vpop.permute.xlu0 %1564  ;;  %v1626_v12 = vpop.f32.mrf.mxu0 }
 0x427   : > { %v1503_v36 = vpop.permute.xlu1 %1502  ;;  %v1599_v60 = vadd.f32 %v1598_v63, %v3527_v33  ;;  %v1612_v7 = vadd.f32 %v1611_v42, %v3527_v33  ;;  %v1625_v45 = vadd.f32 %v1624_v2, %v3527_v33 }
 0x428   : > { %v1537_v49 = vsel %vm803_vm11, %v1503_v36, %v1505_v11 }
 0x429   : > { %v1667_v41 = vmul.f32 %v1599_v60, %v3086_v39  ;;  %v1668_v50 = vmul.f32 %v1612_v7, %v3089_v40  ;;  %v1669_v32 = vmul.f32 %v1625_v45, %v3095_v21  ;;  %1634 = vmatpush.bf16.msra.mxu1 %v1537_v49 }
 0x42b   : > { %v1687_v38 = vadd.f32 %v1681_v14, %v1667_v41  ;;  %v1688_v48 = vadd.f32 %v1682_v28, %v1668_v50  ;;  %v1689_v53 = vadd.f32 %v1683_v10, %v1669_v32  ;;  %v3543_v10 = vld.sshfl [vmem:[#allocation1 + $0x8] sm:$0xff pattern:$0x75316420] }
 0x42d   : > { %v1690_v51 = vpack.c.bf16 %v1688_v48, %v1687_v38  ;;  %v1691_v20 = vpack.c.bf16 %v1689_v53, %v1689_v53  ;;  %1635 = vmatpush.bf16.msra.mxu1 %v1534_v46  ;;  %v1600_v22 = vpop.f32.mrf.mxu2  ;;  %v1613_v58 = vpop.f32.mrf.mxu3 }
 0x42f   : > { %v1713_v52 = vunpack.c.l.b16 %v1690_v51  ;;  %v1714_v44 = vunpack.c.h.b16 %v1690_v51  ;;  %v1715_v3 = vunpack.c.l.b16 %v1691_v20 }
 0x430   : > { %2549 = vmatmul.msk.bf16.vlgmr.msra.gmra.mxu1 %vm1567_vm13, %v3444_v26 }
 0x431   : > { %v1716_v54 = vpack.c.b16 %v1713_v52, %v1713_v52  ;;  %v1717_v19 = vpack.c.b16 %v1714_v44, %v1714_v44  ;;  %v1718_v9 = vpack.c.b16 %v1715_v3, %v1715_v3 }
 0x433   : > { %v1719_v17 = vrot.slane %v1716_v54, 6  ;;  %v1720_v47 = vrot.slane %v1717_v19, 4  ;;  %v1721_v25 = vrot.slane %v1718_v9, 2 }
 0x435   : > { %v1724_v16 = vsel %vm492_vm2, 0, %v1719_v17  ;;  %v1728_v14 = vsel %vm1725_vm14, %v1720_v47, %v1721_v25 }
 0x436   : > { %v1729_v28 = vsel %vm501_vm4, %v1724_v16, %v1728_v14 }
 0x437   : > { %1731 = vst [vmem:[#allocation3] sm:$0xff] %v1729_v28 }
 0x438   : > { %1758 = vst [vmem:[#allocation1] ss:$4 sm:$0xff] %v1729_v28 }
 0x43e   : > { %v1755_v2 = vld [vmem:[#allocation3 + $0x2] sm:$0x3f] }
 0x43f   : > { %v3548_v26 = vld.sshfl [vmem:[#allocation1] sm:$0xff pattern:$0x73625140]  ;;  %v3550_v55 = vld.sshfl [vmem:[#allocation1 + $0x8] sm:$0xff pattern:$0x73625140] }
 0x440   : > { %v3552_v15 = vld.sshfl [vmem:[#allocation1 + $0x10] sm:$0xff pattern:$0x73625140]  ;;  %v3554_v1 = vld.sshfl [vmem:[#allocation1 + $0x18] sm:$0xff pattern:$0x73625140] }
 0x441   : > { %1764 = vst [vmem:[#allocation1 + $0x1] ss:$4 sm:$0xff] %v1729_v28  ;;  %v1756_v42 = vld [vmem:[#allocation3 + $0x2] sm:$0xff] }
 0x448   : > { %v1765_v34 = vld.sshfl [vmem:[#allocation1] sm:$0xff pattern:$0x73625140]  ;;  %v1767_v13 = vld.sshfl [vmem:[#allocation1 + $0x8] sm:$0xff pattern:$0x73625140] }
 0x449   : > { %v1769_v11 = vld.sshfl [vmem:[#allocation1 + $0x10] sm:$0xff pattern:$0x73625140]  ;;  %v1771_v24 = vld.sshfl [vmem:[#allocation1 + $0x18] sm:$0xff pattern:$0x73625140]  ;;  %1775 = vrot.lane.b32.xlu2 %v1767_v13, %s2613_s12  ;;  %1773 = vrot.lane.b32.xlu1 %v1765_v34, %s2613_s12 }
 0x44a   : > { %1785 = vst [vmem:[#allocation1 + $0x2] ss:$4 sm:$0xff] %v1729_v28  ;;  %1777 = vrot.lane.b32.xlu0 %v1769_v11, %s2613_s12 }
 0x451   : > { %v1786_v37 = vld.sshfl [vmem:[#allocation1] sm:$0xff pattern:$0x73625140]  ;;  %v1788_v29 = vld.sshfl [vmem:[#allocation1 + $0x8] sm:$0xff pattern:$0x73625140]  ;;  %1779 = vrot.lane.b32.xlu2 %v1771_v24, %s2613_s12 }
 0x452   : > { %v1790_v30 = vld.sshfl [vmem:[#allocation1 + $0x10] sm:$0xff pattern:$0x73625140]  ;;  %v1792_v31 = vld.sshfl [vmem:[#allocation1 + $0x18] sm:$0xff pattern:$0x73625140]  ;;  %1796 = vrot.lane.b32.xlu0 %v1788_v29, %s2614_s13 }
 0x453   : > { %1806 = vst [vmem:[#allocation1 + $0x3] ss:$4 sm:$0xff] %v1729_v28  ;;  %1798 = vrot.lane.b32.xlu1 %v1790_v30, %s2614_s13 }
 0x459   : > { %1794 = vrot.lane.b32.xlu2 %v1786_v37, %s2614_s13 }
 0x45a   : > { %v1807_v35 = vld.sshfl [vmem:[#allocation1] sm:$0xff pattern:$0x73625140]  ;;  %v1809_v43 = vld.sshfl [vmem:[#allocation1 + $0x8] sm:$0xff pattern:$0x73625140]  ;;  %1800 = vrot.lane.b32.xlu0 %v1792_v31, %s2614_s13 }
 0x45b   : > { %v1811_v57 = vld.sshfl [vmem:[#allocation1 + $0x10] sm:$0xff pattern:$0x73625140]  ;;  %v1813_v63 = vld.sshfl [vmem:[#allocation1 + $0x18] sm:$0xff pattern:$0x73625140]  ;;  %1817 = vrot.lane.b32.xlu1 %v1809_v43, %s2615_s14 }
 0x45c   : > { %1827 = vst [vmem:[#allocation1] ss:$4 sm:$0xff] %v1755_v2 }
 0x461   : > { %1819 = vrot.lane.b32.xlu2 %v1811_v57, %s2615_s14 }
 0x462   : > { %1815 = vrot.lane.b32.xlu0 %v1807_v35, %s2615_s14 }
 0x463   : > { %v1828_v12 = vld.sshfl [vmem:[#allocation1] sm:$0xff pattern:$0x73625140]  ;;  %v1830_v36 = vld.sshfl [vmem:[#allocation1 + $0x8] sm:$0xff pattern:$0x73625140]  ;;  %1821 = vrot.lane.b32.xlu1 %v1813_v63, %s2615_s14 }
 0x464   : > { %v1832_v60 = vld.sshfl [vmem:[#allocation1 + $0x10] sm:$0xff pattern:$0x73625140] }
 0x465   : > { %1844 = vst [vmem:[#allocation1 + $0x1] ss:$4 sm:$0xff] %v1756_v42 }
 0x469   : > { %1836 = vrot.lane.b32.xlu2 %v1830_v36, %s2616_s15 }
 0x46b   : > { %1834 = vrot.lane.b32.xlu1 %v1828_v12, %s2616_s15 }
 0x46c   : > { %v1845_v7 = vld.sshfl [vmem:[#allocation1] sm:$0xff pattern:$0x73625140]  ;;  %v1847_v45 = vld.sshfl [vmem:[#allocation1 + $0x8] sm:$0xff pattern:$0x73625140] }
 0x46d   : > { %v1849_v49 = vld.sshfl [vmem:[#allocation1 + $0x10] sm:$0xff pattern:$0x73625140]  ;;  %v1851_v6 = vld.sshfl [vmem:[#allocation1 + $0x18] sm:$0xff pattern:$0x73625140]  ;;  %1853 = vrot.lane.b32.xlu0 %v1845_v7, %s2617_s16 }
 0x46e   : > { %1865 = vst [vmem:[#allocation1 + $0x2] ss:$4 sm:$0xff] %v1756_v42 }
 0x471   : > { %1838 = vrot.lane.b32.xlu2 %v1832_v60, %s2616_s15 }
 0x473   : > { %1855 = vrot.lane.b32.xlu1 %v1847_v45, %s2617_s16 }
 0x475   : > { %v1866_v41 = vld.sshfl [vmem:[#allocation1] sm:$0xff pattern:$0x73625140]  ;;  %v1868_v50 = vld.sshfl [vmem:[#allocation1 + $0x8] sm:$0xff pattern:$0x73625140]  ;;  %1857 = vrot.lane.b32.xlu0 %v1849_v49, %s2617_s16 }
 0x476   : > { %v1870_v32 = vld.sshfl [vmem:[#allocation1 + $0x10] sm:$0xff pattern:$0x73625140]  ;;  %v1872_v38 = vld.sshfl [vmem:[#allocation1 + $0x18] sm:$0xff pattern:$0x73625140] }
 0x477   : > { %1886 = vst [vmem:[#allocation1 + $0x3] ss:$4 sm:$0xff] %v1756_v42 }
 0x47b   : > { %1876 = vrot.lane.b32.xlu1 %v1868_v50, %s2618_s17 }
 0x47d   : > { %1859 = vrot.lane.b32.xlu0 %v1851_v6, %s2617_s16 }
 0x47e   : > { %v1891_v48 = vld.sshfl [vmem:[#allocation1 + $0x10] sm:$0xff pattern:$0x73625140]  ;;  %v1893_v53 = vld.sshfl [vmem:[#allocation1 + $0x18] sm:$0xff pattern:$0x73625140] }
 0x47f   : > { %v1889_v46 = vld.sshfl [vmem:[#allocation1 + $0x8] sm:$0xff pattern:$0x73625140]  ;;  %v1887_v51 = vld.sshfl [vmem:[#allocation1] sm:$0xff pattern:$0x73625140] }
 0x480   : > { %1897 = vrot.lane.b32.xlu2 %v1889_v46, %s2619_s18  ;;  %1906 = vst [vmem:[#allocation1] ss:$4 sm:$0xff] %v1756_v42 }
 0x483   : > { %1895 = vrot.lane.b32.xlu1 %v1887_v51, %s2619_s18 }
 0x485   : > { %1874 = vrot.lane.b32.xlu0 %v1866_v41, %s2618_s17 }
 0x487   : > { %v1909_v20 = vld.sshfl [vmem:[#allocation1 + $0x8] sm:$0xff pattern:$0x73625140]  ;;  %v1911_v22 = vld.sshfl [vmem:[#allocation1 + $0x10] sm:$0xff pattern:$0x73625140] }
 0x488   : > { %1917 = vrot.lane.b32.xlu2 %v1909_v20, %s2620_s19  ;;  %v1907_v58 = vld.sshfl [vmem:[#allocation1] sm:$0xff pattern:$0x73625140]  ;;  %v1913_v52 = vld.sshfl [vmem:[#allocation1 + $0x18] sm:$0xff pattern:$0x73625140] }
 0x48b   : > { %1899 = vrot.lane.b32.xlu1 %v1891_v48, %s2619_s18 }
 0x48d   : > { %1878 = vrot.lane.b32.xlu0 %v1870_v32, %s2618_s17 }
 0x490   : > { %1919 = vrot.lane.b32.xlu2 %v1911_v22, %s2620_s19 }
 0x493   : > { %1915 = vrot.lane.b32.xlu1 %v1907_v58, %s2620_s19 }
 0x495   : > { %1880 = vrot.lane.b32.xlu0 %v1872_v38, %s2618_s17 }
 0x49b   : > { %1921 = vrot.lane.b32.xlu1 %v1913_v52, %s2620_s19 }
 0x49d   : > { %1901 = vrot.lane.b32.xlu0 %v1893_v53, %s2619_s18 }
 0x4a3   : > { %v1776_v34 = vpop.permute.xlu2 %1775 }
 0x4a6   : > { %v1663_v44 = vpop.f32.mrf.mxu3 }
 0x4a7   : > { %v1650_v3 = vpop.f32.mrf.mxu2  ;;  %v1664_v54 = vadd.f32 %v1663_v44, %v3527_v33 }
 0x4a8   : > { %v1651_v9 = vadd.f32 %v1650_v3, %v3527_v33 }
 0x4a9   : > { %v1672_v19 = vmul.f32 %v1664_v54, %v3199_v0 }
 0x4aa   : > { %v1671_v25 = vmul.f32 %v1651_v9, %v3193_v4 }
 0x4ab   : > { %v1708_v17 = vadd.f32 %v3539_v23, %v1672_v19  ;;  %v1780_v63 = vpop.permute.xlu2 %1779 }
 0x4ac   : > { %v1707_v24 = vadd.f32 %v3543_v10, %v1671_v25  ;;  %v1933_v44 = vsel %vm492_vm2, %v3554_v1, %v1780_v63 }
 0x4ad   : > { %v1637_v47 = vpop.f32.mrf.mxu1  ;;  %v1710_v16 = vpack.c.bf16 %v1708_v17, %v1708_v17 }
 0x4ae   : > { %v1638_v14 = vadd.f32 %v1637_v47, %v3527_v33  ;;  %v1665_v28 = vpop.f32.mrf.mxu3 }
 0x4af   : > { %v1652_v13 = vpop.f32.mrf.mxu2  ;;  %v1737_v37 = vunpack.c.l.b16 %v1710_v16 }
 0x4b0   : > { %v1670_v11 = vmul.f32 %v1638_v14, %v3189_v18 }
 0x4b1   : > { %v1740_v2 = vpack.c.b16 %v1737_v37, %v1737_v37 }
 0x4b2   : > { %v1706_v29 = vadd.f32 %v3541_v56, %v1670_v11 }
 0x4b3   : > { %v1743_v42 = vrot.slane %v1740_v2, 2  ;;  %v1795_v41 = vpop.permute.xlu2 %1794 }
 0x4b4   : > { %v1709_v30 = vpack.c.bf16 %v1707_v24, %v1706_v29 }
 0x4b5   : > { %v1639_v31 = vpop.f32.mrf.mxu1 }
 0x4b6   : > { %v1735_v23 = vunpack.c.l.b16 %v1709_v30  ;;  %v1736_v35 = vunpack.c.h.b16 %v1709_v30 }
 0x4b8   : > { %v1738_v43 = vpack.c.b16 %v1735_v23, %v1735_v23  ;;  %v1739_v57 = vpack.c.b16 %v1736_v35, %v1736_v35 }
 0x4ba   : > { %v1741_v33 = vrot.slane %v1738_v43, 6  ;;  %v1742_v12 = vrot.slane %v1739_v57, 4 }
 0x4bb   : > { %v1774_v36 = vpop.permute.xlu1 %1773  ;;  %v1820_v19 = vpop.permute.xlu2 %1819 }
 0x4bc   : > { %v1745_v60 = vsel %vm492_vm2, 0, %v1741_v33  ;;  %v1748_v7 = vsel %vm1725_vm14, %v1742_v12, %v1743_v42  ;;  %v1778_v10 = vpop.permute.xlu0 %1777  ;;  %v1781_v45 = vsel %vm339_vm0, %v1774_v36, %v1776_v34 }
 0x4bd   : > { %v1749_v56 = vsel %vm501_vm4, %v1745_v60, %v1748_v7  ;;  %v1782_v49 = vsel %vm339_vm0, %v1776_v34, %v1778_v10  ;;  %v1783_v6 = vsel %vm339_vm0, %v1778_v10, %v1780_v63  ;;  %v1927_v32 = vsel %vm492_vm2, %v3548_v26, %v1781_v45 }
 0x4be   : > { %1751 = vst [vmem:[#allocation3 + $0xa] sm:$0xff] %v1749_v56  ;;  %v1929_v51 = vsel %vm492_vm2, %v3550_v55, %v1782_v49  ;;  %v1931_v54 = vsel %vm492_vm2, %v3552_v15, %v1783_v6 }
 0x4bf   : > { %1982 = vst [vmem:[#allocation1] ss:$4 sm:$0xff] %v1749_v56 }
 0x4c3   : > { %v1837_v60 = vpop.permute.xlu2 %1836 }
 0x4c4   : > { %v1797_v50 = vpop.permute.xlu0 %1796 }
 0x4c5   : > { %v1799_v38 = vpop.permute.xlu1 %1798  ;;  %v1802_v48 = vsel %vm361_vm1, %v1795_v41, %v1797_v50  ;;  %v1979_v63 = vld [vmem:[#allocation3 + $0xc] sm:$0x3f] }
 0x4c6   : > { %v3605_v53 = vld.sshfl [vmem:[#allocation1] sm:$0xff pattern:$0x73625140]  ;;  %v3607_v46 = vld.sshfl [vmem:[#allocation1 + $0x8] sm:$0xff pattern:$0x73625140]  ;;  %v1803_v20 = vsel %vm361_vm1, %v1797_v50, %v1799_v38  ;;  %v1935_v22 = vsel %vm501_vm4, %v1927_v32, %v1802_v48 }
 0x4c7   : > { %v3613_v58 = vld.sshfl [vmem:[#allocation1 + $0x10] sm:$0xff pattern:$0x73625140]  ;;  %v3615_v52 = vld.sshfl [vmem:[#allocation1 + $0x18] sm:$0xff pattern:$0x73625140]  ;;  %v1937_v26 = vsel %vm501_vm4, %v1929_v51, %v1803_v20 }
 0x4c8   : > { %1988 = vst [vmem:[#allocation1 + $0x1] ss:$4 sm:$0xff] %v1749_v56  ;;  %v1980_v50 = vld [vmem:[#allocation3 + $0xc] sm:$0xff] }
 0x4cc   : > { %v1801_v3 = vpop.permute.xlu0 %1800 }
 0x4cd   : > { %v1804_v55 = vsel %vm361_vm1, %v1799_v38, %v1801_v3  ;;  %v1941_v9 = vsel %vm501_vm4, %v1933_v44, %v1801_v3  ;;  %v1818_v17 = vpop.permute.xlu1 %1817 }
 0x4ce   : > { %v1939_v47 = vsel %vm501_vm4, %v1931_v54, %v1804_v55  ;;  %v1824_v25 = vsel %vm383_vm3, %v1818_v17, %v1820_v19 }
 0x4cf   : > { %v1989_v16 = vld.sshfl [vmem:[#allocation1] sm:$0xff pattern:$0x73625140]  ;;  %v1991_v14 = vld.sshfl [vmem:[#allocation1 + $0x8] sm:$0xff pattern:$0x73625140]  ;;  %v3627_v28 = vsel %vm510_vm5, %v1937_v26, %v1824_v25 }
 0x4d0   : > { %v1993_v1 = vld.sshfl [vmem:[#allocation1 + $0x10] sm:$0xff pattern:$0x73625140]  ;;  %v1995_v34 = vld.sshfl [vmem:[#allocation1 + $0x18] sm:$0xff pattern:$0x73625140]  ;;  %1999 = vrot.lane.b32.xlu2 %v1991_v14, %s2613_s12  ;;  %1997 = vrot.lane.b32.xlu1 %v1989_v16, %s2613_s12 }
 0x4d1   : > { %2009 = vst [vmem:[#allocation1 + $0x2] ss:$4 sm:$0xff] %v1749_v56  ;;  %2001 = vrot.lane.b32.xlu0 %v1993_v1, %s2613_s12 }
 0x4d4   : > { %v1816_v15 = vpop.permute.xlu0 %1815 }
 0x4d5   : > { %v1822_v13 = vpop.permute.xlu1 %1821  ;;  %v1823_v11 = vsel %vm383_vm3, %v1816_v15, %v1818_v17 }
 0x4d6   : > { %v1825_v24 = vsel %vm383_vm3, %v1820_v19, %v1822_v13  ;;  %v3635_v37 = vsel %vm510_vm5, %v1941_v9, %v1822_v13  ;;  %v3638_v29 = vsel %vm510_vm5, %v1935_v22, %v1823_v11  ;;  %v1839_v9 = vpop.permute.xlu2 %1838 }
 0x4d7   : > { %v3641_v30 = vsel %vm510_vm5, %v1939_v47, %v1825_v24 }
 0x4d8   : > { %v2010_v31 = vld.sshfl [vmem:[#allocation1] sm:$0xff pattern:$0x73625140]  ;;  %v2012_v2 = vld.sshfl [vmem:[#allocation1 + $0x8] sm:$0xff pattern:$0x73625140] }
 0x4d9   : > { %v2014_v23 = vld.sshfl [vmem:[#allocation1 + $0x10] sm:$0xff pattern:$0x73625140]  ;;  %v2016_v35 = vld.sshfl [vmem:[#allocation1 + $0x18] sm:$0xff pattern:$0x73625140]  ;;  %2003 = vrot.lane.b32.xlu0 %v1995_v34, %s2613_s12  ;;  %2018 = vrot.lane.b32.xlu2 %v2010_v31, %s2614_s13 }
 0x4da   : > { %2030 = vst [vmem:[#allocation1 + $0x3] ss:$4 sm:$0xff] %v1749_v56  ;;  %2022 = vrot.lane.b32.xlu1 %v2014_v23, %s2614_s13 }
 0x4dd   : > { %v3646_v43 = vpop.permute.xlu1 %1834 }
 0x4de   : > { %v1840_v10 = vsel %vm401_vm9, %v3646_v43, %v1837_v60  ;;  %v1898_v34 = vpop.permute.xlu2 %1897 }
 0x4df   : > { %v3648_v57 = vpop.permute.xlu0 %1853 }
 0x4e1   : > { %v2031_v42 = vld.sshfl [vmem:[#allocation1] sm:$0xff pattern:$0x73625140]  ;;  %v2033_v33 = vld.sshfl [vmem:[#allocation1 + $0x8] sm:$0xff pattern:$0x73625140]  ;;  %2020 = vrot.lane.b32.xlu0 %v2012_v2, %s2614_s13  ;;  %2024 = vrot.lane.b32.xlu2 %v2016_v35, %s2614_s13  ;;  %v1841_v2 = vsel %vm401_vm9, %v1837_v60, %v1839_v9 }
 0x4e2   : > { %v2035_v12 = vld.sshfl [vmem:[#allocation1 + $0x10] sm:$0xff pattern:$0x73625140]  ;;  %v2037_v36 = vld.sshfl [vmem:[#allocation1 + $0x18] sm:$0xff pattern:$0x73625140] }
 0x4e3   : > { %2051 = vst [vmem:[#allocation1] ss:$4 sm:$0xff] %v1979_v63  ;;  %2043 = vrot.lane.b32.xlu1 %v2035_v12, %s2615_s14 }
 0x4e5   : > { %v1856_v7 = vpop.permute.xlu1 %1855 }
 0x4e6   : > { %v1861_v45 = vsel %vm423_vm6, %v3648_v57, %v1856_v7 }
 0x4e7   : > { %v3658_v56 = vsel %vm492_vm2, %v1840_v10, %v1861_v45  ;;  %v1858_v49 = vpop.permute.xlu0 %1857 }
 0x4e8   : > { %v1862_v11 = vsel %vm423_vm6, %v1856_v7, %v1858_v49 }
 0x4e9   : > { %2041 = vrot.lane.b32.xlu0 %v2033_v33, %s2615_s14  ;;  %2039 = vrot.lane.b32.xlu2 %v2031_v42, %s2615_s14  ;;  %v1958_v23 = vsel %vm492_vm2, %v1841_v2, %v1862_v11  ;;  %v1918_v42 = vpop.permute.xlu2 %1917 }
 0x4ea   : > { %v2052_v6 = vld.sshfl [vmem:[#allocation1] sm:$0xff pattern:$0x73625140]  ;;  %v2054_v41 = vld.sshfl [vmem:[#allocation1 + $0x8] sm:$0xff pattern:$0x73625140] }
 0x4eb   : > { %v2056_v32 = vld.sshfl [vmem:[#allocation1 + $0x10] sm:$0xff pattern:$0x73625140] }
 0x4ec   : > { %2068 = vst [vmem:[#allocation1 + $0x1] ss:$4 sm:$0xff] %v1980_v50 }
 0x4ed   : > { %v3670_v55 = vpop.permute.xlu1 %1876 }
 0x4ef   : > { %v1860_v38 = vpop.permute.xlu0 %1859 }
 0x4f1   : > { %2045 = vrot.lane.b32.xlu0 %v2037_v36, %s2615_s14  ;;  %2058 = vrot.lane.b32.xlu2 %v2052_v6, %s2616_s15  ;;  %v1863_v36 = vsel %vm423_vm6, %v1858_v49, %v1860_v38 }
 0x4f2   : > { %v1961_v45 = vsel %vm492_vm2, %v1839_v9, %v1863_v36 }
 0x4f3   : > { %v2069_v48 = vld.sshfl [vmem:[#allocation1] sm:$0xff pattern:$0x73625140]  ;;  %v2071_v51 = vld.sshfl [vmem:[#allocation1 + $0x8] sm:$0xff pattern:$0x73625140] }
 0x4f4   : > { %v2073_v20 = vld.sshfl [vmem:[#allocation1 + $0x10] sm:$0xff pattern:$0x73625140]  ;;  %v2075_v22 = vld.sshfl [vmem:[#allocation1 + $0x18] sm:$0xff pattern:$0x73625140]  ;;  %2077 = vrot.lane.b32.xlu1 %v2069_v48, %s2617_s16 }
 0x4f5   : > { %2089 = vst [vmem:[#allocation1 + $0x2] ss:$4 sm:$0xff] %v1980_v50  ;;  %v1896_v1 = vpop.permute.xlu1 %1895 }
 0x4f7   : > { %v3667_v3 = vpop.permute.xlu0 %1874 }
 0x4f9   : > { %2060 = vrot.lane.b32.xlu0 %v2054_v41, %s2616_s15  ;;  %2062 = vrot.lane.b32.xlu2 %v2056_v32, %s2616_s15 }
 0x4fc   : > { %v2090_v26 = vld.sshfl [vmem:[#allocation1] sm:$0xff pattern:$0x73625140]  ;;  %v2092_v44 = vld.sshfl [vmem:[#allocation1 + $0x8] sm:$0xff pattern:$0x73625140] }
 0x4fd   : > { %v2094_v54 = vld.sshfl [vmem:[#allocation1 + $0x10] sm:$0xff pattern:$0x73625140]  ;;  %v2096_v19 = vld.sshfl [vmem:[#allocation1 + $0x18] sm:$0xff pattern:$0x73625140]  ;;  %2098 = vrot.lane.b32.xlu1 %v2090_v26, %s2618_s17  ;;  %v1900_v31 = vpop.permute.xlu1 %1899  ;;  %v1952_v26 = vsel %vm492_vm2, %v3646_v43, %v3648_v57 }
 0x4fe   : > { %2110 = vst [vmem:[#allocation1 + $0x3] ss:$4 sm:$0xff] %v1980_v50  ;;  %v1904_v63 = vsel %vm467_vm8, %v1898_v34, %v1900_v31 }
 0x4ff   : > { %v1879_v25 = vpop.permute.xlu0 %1878 }
 0x500   : > { %v1883_v24 = vsel %vm445_vm7, %v3670_v55, %v1879_v25 }
 0x501   : > { %2081 = vrot.lane.b32.xlu0 %v2073_v20, %s2617_s16  ;;  %2079 = vrot.lane.b32.xlu2 %v2071_v51, %s2617_s16  ;;  %v1967_v35 = vsel %vm501_vm4, %v1958_v23, %v1883_v24 }
 0x502   : > { %v1975_v33 = vsel %vm510_vm5, %v1967_v35, %v1904_v63 }
 0x505   : > { %v2113_v17 = vld.sshfl [vmem:[#allocation1 + $0x8] sm:$0xff pattern:$0x73625140]  ;;  %v2111_v47 = vld.sshfl [vmem:[#allocation1] sm:$0xff pattern:$0x73625140]  ;;  %v1916_v32 = vpop.permute.xlu1 %1915 }
 0x506   : > { %2119 = vrot.lane.b32.xlu1 %v2111_v47, %s2619_s18  ;;  %v2115_v16 = vld.sshfl [vmem:[#allocation1 + $0x10] sm:$0xff pattern:$0x73625140]  ;;  %v2117_v14 = vld.sshfl [vmem:[#allocation1 + $0x18] sm:$0xff pattern:$0x73625140] }
 0x507   : > { %2130 = vst [vmem:[#allocation1] ss:$4 sm:$0xff] %v1980_v50  ;;  %v1881_v15 = vpop.permute.xlu0 %1880  ;;  %v1920_v50 = vpop.permute.xlu2 %1919 }
 0x508   : > { %v1884_v60 = vsel %vm445_vm7, %v1879_v25, %v1881_v15  ;;  %v1924_v38 = vsel %vm488_vm10, %v1918_v42, %v1920_v50 }
 0x509   : > { %2083 = vrot.lane.b32.xlu0 %v2075_v22, %s2617_s16  ;;  %2100 = vrot.lane.b32.xlu2 %v2092_v44, %s2618_s17  ;;  %v1969_v6 = vsel %vm501_vm4, %v1961_v45, %v1884_v60  ;;  %v1963_v44 = vsel %vm501_vm4, %v1952_v26, %v3667_v3 }
 0x50d   : > { %v1922_v20 = vpop.permute.xlu1 %1921 }
 0x50e   : > { %2123 = vrot.lane.b32.xlu1 %v2115_v16, %s2619_s18  ;;  %v2133_v13 = vld.sshfl [vmem:[#allocation1 + $0x8] sm:$0xff pattern:$0x73625140]  ;;  %v2135_v10 = vld.sshfl [vmem:[#allocation1 + $0x10] sm:$0xff pattern:$0x73625140]  ;;  %v1925_v22 = vsel %vm488_vm10, %v1920_v50, %v1922_v20 }
 0x50f   : > { %v1902_v12 = vpop.permute.xlu0 %1901  ;;  %v2137_v49 = vld.sshfl [vmem:[#allocation1 + $0x18] sm:$0xff pattern:$0x73625140]  ;;  %v2131_v48 = vld.sshfl [vmem:[#allocation1] sm:$0xff pattern:$0x73625140] }
 0x510   : > { %v1905_v7 = vsel %vm467_vm8, %v1900_v31, %v1902_v12 }
 0x511   : > { %2102 = vrot.lane.b32.xlu2 %v2094_v54, %s2618_s17  ;;  %2141 = vrot.lane.b32.xlu0 %v2133_v13, %s2620_s19  ;;  %v1977_v41 = vsel %vm510_vm5, %v1969_v6, %v1905_v7 }
 0x516   : > { %2125 = vrot.lane.b32.xlu1 %v2117_v14, %s2619_s18 }
 0x519   : > { %2104 = vrot.lane.b32.xlu2 %v2096_v19, %s2618_s17  ;;  %2222 = vrot.lane.b32.xlu0 %v1975_v33, %s2621_s20  ;;  %v1971_v19 = vsel %vm510_vm5, %v1963_v44, %v1896_v1 }
 0x51e   : > { %2143 = vrot.lane.b32.xlu1 %v2135_v10, %s2620_s19 }
 0x521   : > { %2121 = vrot.lane.b32.xlu2 %v2113_v17, %s2619_s18  ;;  %2224 = vrot.lane.b32.xlu0 %v1977_v41, %s2621_s20 }
 0x526   : > { %2145 = vrot.lane.b32.xlu1 %v2137_v49, %s2620_s19 }
 0x529   : > { %2230 = vrot.lane.b32.xlu0 %v1924_v38, %s2621_s20  ;;  %2139 = vrot.lane.b32.xlu2 %v2131_v48, %s2620_s19 }
 0x52a   : > { %v3704_v51 = vpop.permute.xlu2 %1999 }
 0x52e   : > { %2210 = vrot.lane.b32.xlu1 %v3638_v29, %s2621_s20  ;;  %v1882_v29 = vsel %vm445_vm7, %v3667_v3, %v3670_v55 }
 0x52f   : > { %v1965_v57 = vsel %vm501_vm4, %v3658_v56, %v1882_v29 }
 0x531   : > { %2232 = vrot.lane.b32.xlu0 %v1925_v22, %s2621_s20  ;;  %2212 = vrot.lane.b32.xlu2 %v3627_v28, %s2621_s20  ;;  %v1903_v28 = vsel %vm467_vm8, %v1896_v1, %v1898_v34 }
 0x532   : > { %v1973_v9 = vsel %vm510_vm5, %v1965_v57, %v1903_v28 }
 0x533   : > { %v2019_v54 = vpop.permute.xlu2 %2018 }
 0x536   : > { %2218 = vrot.lane.b32.xlu1 %v1971_v19, %s2621_s20 }
 0x539   : > { %2214 = vrot.lane.b32.xlu2 %v3641_v30, %s2621_s20  ;;  %v1923_v30 = vsel %vm488_vm10, %v1916_v32, %v1918_v42 }
 0x53b   : > { %v2025_v43 = vpop.permute.xlu2 %2024 }
 0x53e   : > { %2226 = vrot.lane.b32.xlu1 %v1916_v32, %s2621_s20 }
 0x541   : > { %2220 = vrot.lane.b32.xlu2 %v1973_v9, %s2621_s20 }
 0x542   : > { %v1998_v17 = vpop.permute.xlu1 %1997 }
 0x543   : > { %v2002_v47 = vpop.permute.xlu0 %2001  ;;  %v2040_v25 = vpop.permute.xlu2 %2039  ;;  %v2005_v11 = vsel %vm339_vm0, %v1998_v17, %v3704_v51 }
 0x549   : > { %2228 = vrot.lane.b32.xlu2 %v1923_v30, %s2621_s20 }
 0x54b   : > { %v2004_v3 = vpop.permute.xlu0 %2003  ;;  %v2059_v55 = vpop.permute.xlu2 %2058 }
 0x54c   : > { %v2007_v16 = vsel %vm339_vm0, %v2002_v47, %v2004_v3  ;;  %v2157_v56 = vsel %vm492_vm2, %v3615_v52, %v2004_v3  ;;  %v2023_v14 = vpop.permute.xlu1 %2022  ;;  %v2151_v52 = vsel %vm492_vm2, %v3605_v53, %v2005_v11 }
 0x54d   : > { %v2155_v1 = vsel %vm492_vm2, %v3613_v58, %v2007_v16  ;;  %v2028_v34 = vsel %vm361_vm1, %v2023_v14, %v2025_v43  ;;  %v3739_v15 = vsel %vm501_vm4, %v2157_v56, %v2025_v43 }
 0x54e   : > { %v3742_v13 = vsel %vm501_vm4, %v2155_v1, %v2028_v34 }
 0x553   : > { %v2021_v24 = vpop.permute.xlu0 %2020  ;;  %v3746_v31 = vpop.permute.xlu2 %2062 }
 0x554   : > { %v2026_v2 = vsel %vm361_vm1, %v2019_v54, %v2021_v24  ;;  %v2006_v54 = vsel %vm339_vm0, %v3704_v51, %v2002_v47  ;;  %v2027_v43 = vsel %vm361_vm1, %v2021_v24, %v2023_v14  ;;  %vm2423_vm0 = vcmask 15360  }
 0x555   : > { %v2159_v58 = vsel %vm501_vm4, %v2151_v52, %v2026_v2  ;;  %v3754_v33 = vpop.permute.xlu1 %2043  ;;  %v2153_v9 = vsel %vm492_vm2, %v3607_v46, %v2006_v54  ;;  %v1753_v54 = vld [vmem:[%s3894_s2] sm:$0xf]  ;;  %vm2425_vm1 = vcmask 23552  }
 0x556   : > { %v2161_v17 = vsel %vm501_vm4, %v2153_v9, %v2027_v43 }
 0x55b   : > { %v2042_v23 = vpop.permute.xlu0 %2041  ;;  %v2080_v35 = vpop.permute.xlu2 %2079 }
 0x55c   : > { %v2047_v63 = vsel %vm383_vm3, %v2040_v25, %v2042_v23  ;;  %v2048_v28 = vsel %vm383_vm3, %v2042_v23, %v3754_v33 }
 0x55d   : > { %v2167_v42 = vsel %vm510_vm5, %v2159_v58, %v2047_v63  ;;  %v2169_v51 = vsel %vm510_vm5, %v2161_v17, %v2048_v28 }
 0x563   : > { %v3756_v12 = vpop.permute.xlu0 %2045  ;;  %v2101_v36 = vpop.permute.xlu2 %2100 }
 0x566   : > { %v2078_v60 = vpop.permute.xlu1 %2077 }
 0x567   : > { %v2176_v50 = vsel %vm492_vm2, %v2059_v55, %v2078_v60  ;;  %v2085_v32 = vsel %vm423_vm6, %v2078_v60, %v2080_v35 }
 0x56b   : > { %v2061_v7 = vpop.permute.xlu0 %2060  ;;  %v2103_v10 = vpop.permute.xlu2 %2102 }
 0x56c   : > { %v2064_v41 = vsel %vm401_vm9, %v2059_v55, %v2061_v7  ;;  %v2065_v14 = vsel %vm401_vm9, %v2061_v7, %v3746_v31 }
 0x56d   : > { %v2179_v48 = vsel %vm492_vm2, %v2064_v41, %v2085_v32  ;;  %v2173_v41 = vsel %vm510_vm5, %v3739_v15, %v3756_v12 }
 0x56f   : > { %v2099_v45 = vpop.permute.xlu1 %2098 }
 0x570   : > { %v2187_v49 = vsel %vm501_vm4, %v2176_v50, %v2099_v45  ;;  %v2106_v20 = vsel %vm445_vm7, %v2099_v45, %v2101_v36 }
 0x571   : > { %v2189_v19 = vsel %vm501_vm4, %v2179_v48, %v2106_v20 }
 0x573   : > { %v2082_v53 = vpop.permute.xlu0 %2081  ;;  %v2105_v6 = vpop.permute.xlu2 %2104 }
 0x574   : > { %v2086_v56 = vsel %vm423_vm6, %v2080_v35, %v2082_v53 }
 0x575   : > { %v2182_v1 = vsel %vm492_vm2, %v2065_v14, %v2086_v56 }
 0x578   : > { %v2120_v38 = vpop.permute.xlu1 %2119 }
 0x579   : > { %v2195_v22 = vsel %vm510_vm5, %v2187_v49, %v2120_v38 }
 0x57a   : > { %2265 = vrot.lane.b32.xlu1 %v2195_v22, %s2621_s20 }
 0x57b   : > { %v2084_v26 = vpop.permute.xlu0 %2083  ;;  %v2122_v44 = vpop.permute.xlu2 %2121 }
 0x57c   : > { %v2127_v29 = vsel %vm467_vm8, %v2120_v38, %v2122_v44  ;;  %v2087_v52 = vsel %vm423_vm6, %v2082_v53, %v2084_v26 }
 0x57d   : > { %v2197_v57 = vsel %vm510_vm5, %v2189_v19, %v2127_v29  ;;  %v2185_v63 = vsel %vm492_vm2, %v3746_v31, %v2087_v52 }
 0x57e   : > { %2267 = vrot.lane.b32.xlu2 %v2197_v57, %s2621_s20 }
 0x580   : > { %v2124_v25 = vpop.permute.xlu1 %2123 }
 0x581   : > { %v2128_v34 = vsel %vm467_vm8, %v2122_v44, %v2124_v25 }
 0x582   : > { %2259 = vrot.lane.b32.xlu1 %v2169_v51, %s2621_s20 }
 0x583   : > { %v2142_v47 = vpop.permute.xlu0 %2141  ;;  %v2140_v30 = vpop.permute.xlu2 %2139 }
 0x584   : > { %2273 = vrot.lane.b32.xlu0 %v2140_v30, %s2621_s20  ;;  %v2147_v3 = vsel %vm488_vm10, %v2140_v30, %v2142_v47 }
 0x586   : > { %2216 = vrot.lane.b32.xlu2 %v3635_v37, %s2621_s20  ;;  %v2107_v37 = vsel %vm445_vm7, %v2101_v36, %v2103_v10  ;;  %v2108_v36 = vsel %vm445_vm7, %v2103_v10, %v2105_v6  ;;  %v2049_v10 = vsel %vm383_vm3, %v3754_v33, %v3756_v12  ;;  %v866_v6 = vld [vmem:[%s3895_s3] sm:$0xff]  ;;  %vm2469_vm3 = vcmask 31744  }
 0x587   : > { %v2191_v2 = vsel %vm501_vm4, %v2182_v1, %v2107_v37  ;;  %v2193_v7 = vsel %vm501_vm4, %v2185_v63, %v2108_v36  ;;  %v2171_v49 = vsel %vm510_vm5, %v3742_v13, %v2049_v10 }
 0x588   : > { %v2126_v55 = vpop.permute.xlu1 %2125  ;;  %v2199_v35 = vsel %vm510_vm5, %v2191_v2, %v2128_v34 }
 0x58a   : > { %2275 = vrot.lane.b32.xlu1 %v2147_v3, %s2621_s20 }
 0x58b   : > { %v2223_v46 = vpop.permute.xlu0 %2222  ;;  %v2213_v16 = vpop.permute.xlu2 %2212 }
 0x58c   : > { %2257 = vrot.lane.b32.xlu0 %v2167_v42, %s2621_s20  ;;  %v2129_v42 = vsel %vm467_vm8, %v2124_v25, %v2126_v55 }
 0x58d   : > { %v2201_v53 = vsel %vm510_vm5, %v2193_v7, %v2129_v42  ;;  %vm2471_vm5 = vcmask 25600  }
 0x590   : > { %v2144_v11 = vpop.permute.xlu1 %2143 }
 0x591   : > { %v2148_v24 = vsel %vm488_vm10, %v2142_v47, %v2144_v11 }
 0x592   : > { %2277 = vrot.lane.b32.xlu1 %v2148_v24, %s2621_s20 }
 0x593   : > { %v2225_v58 = vpop.permute.xlu0 %2224  ;;  %v2215_v23 = vpop.permute.xlu2 %2214 }
 0x594   : > { %2269 = vrot.lane.b32.xlu0 %v2199_v35, %s2621_s20  ;;  %v2239_v13 = vsel %vm803_vm11, %v2223_v46, %v2225_v58  ;;  %v2235_v44 = vsel %vm803_vm11, %v2213_v16, %v2215_v23 }
 0x598   : > { %v2146_v60 = vpop.permute.xlu1 %2145 }
 0x599   : > { %v2149_v45 = vsel %vm488_vm10, %v2144_v11, %v2146_v60 }
 0x59a   : > { %2279 = vrot.lane.b32.xlu2 %v2149_v45, %s2621_s20  ;;  %2271 = vrot.lane.b32.xlu1 %v2201_v53, %s2621_s20 }
 0x59b   : > { %v2231_v31 = vpop.permute.xlu0 %2230  ;;  %v2221_v50 = vpop.permute.xlu2 %2220 }
 0x59c   : > { %2263 = vrot.lane.b32.xlu0 %v2173_v41, %s2621_s20  ;;  %v2238_v26 = vsel %vm803_vm11, %v2221_v50, %v2223_v46 }
 0x5a0   : > { %v2211_v32 = vpop.permute.xlu1 %2210 }
 0x5a1   : > { %v2234_v28 = vsel %vm803_vm11, %v2211_v32, %v2213_v16 }
 0x5a2   : > { %2261 = vrot.lane.b32.xlu2 %v2171_v49, %s2621_s20  ;;  %870 = vperm.xlu1 %2588, %v866_v6  }
 0x5a3   : > { %v2233_v15 = vpop.permute.xlu0 %2232  ;;  %v2229_v38 = vpop.permute.xlu2 %2228 }
 0x5a4   : > { %v2242_v48 = vsel %vm803_vm11, %v2231_v31, %v2233_v15  ;;  %v2241_v20 = vsel %vm803_vm11, %v2229_v38, %v2231_v31 }
 0x5a5   : > { %v2312_v22 = vsel %vm492_vm2, %v2242_v48, 0  ;;  %v2309_v33 = vsel %vm492_vm2, %v2241_v20, 0 }
 0x5a6   : > { %2341 = vmatpush.bf16.msrb.mxu1 %v2309_v33  ;;  %2354 = vmatpush.bf16.msrb.mxu2 %v2312_v22 }
 0x5a8   : > { %v2219_v12 = vpop.permute.xlu1 %2218 }
 0x5a9   : > { %v2237_v57 = vsel %vm803_vm11, %v2219_v12, %v2221_v50 }
 0x5aa   : > { %2299 = vperm.xlu2 %2586, %v866_v6   ;;  %2342 = vmatpush.bf16.msrb.mxu1 %v2238_v26 }
 0x5ab   : > { %2355 = vmatpush.bf16.msrb.mxu2 %v2239_v13  ;;  %v2431_v13 = vld [vmem:[%s3897_s5] sm:$0xff] }
 0x5ae   : > { %2343 = vmatpush.bf16.msrb.mxu1 %v2235_v44  ;;  %v2432_v44 = vld [vmem:[%s3897_s5 + $0x8] sm:$0x3] }
 0x5b0   : > { %v2227_v19 = vpop.permute.xlu1 %2226 }
 0x5b1   : > { %v2240_v29 = vsel %vm803_vm11, %v2227_v19, %v2229_v38  ;;  %2553 = vmatmul.msk.bf16.vlgmr.msrb.gmra.mxu1 %vm883_vm12, %v1753_v54 }
 0x5b2   : > { %v2306_v43 = vsel %vm492_vm2, %v2240_v29, 0 }
 0x5b3   : > { %2328 = vmatpush.bf16.msrb.mxu0 %v2306_v43 }
 0x5b7   : > { %2329 = vmatpush.bf16.msrb.mxu0 %v2237_v57 }
 0x5bb   : > { %2330 = vmatpush.bf16.msrb.mxu0 %v2234_v28 }
 0x5be   : > { %2552 = vmatmul.msk.bf16.vlgmr.msrb.gmra.mxu0 %vm883_vm12, %v1753_v54 }
 0x5d8   : > { %v2268_v9 = vpop.permute.xlu2 %2267 }
 0x5e0   : > { %v2217_v17 = vpop.permute.xlu2 %2216 }
 0x5e1   : > { %v2236_v25 = vsel %vm803_vm11, %v2215_v23, %v2217_v17 }
 0x5e2   : > { %2356 = vmatpush.bf16.msrb.mxu2 %v2236_v25 }
 0x5e5   : > { %2554 = vmatmul.msk.bf16.vlgmr.msrb.gmra.mxu2 %vm883_vm12, %v1753_v54 }
 0x5ec   : > { %v2266_v51 = vpop.permute.xlu1 %2265 }
 0x5ed   : > { %v2284_v14 = vsel %vm803_vm11, %v2266_v51, %v2268_v9 }
 0x5f4   : > { %v2260_v47 = vpop.permute.xlu1 %2259  ;;  %v2280_v16 = vpop.permute.xlu2 %2279 }
 0x5f6   : > { %v2274_v30 = vpop.permute.xlu0 %2273 }
 0x5fc   : > { %v2276_v3 = vpop.permute.xlu1 %2275  ;;  %v2262_v23 = vpop.permute.xlu2 %2261 }
 0x5fd   : > { %v2287_v55 = vsel %vm803_vm11, %v2274_v30, %v2276_v3  ;;  %v2282_v42 = vsel %vm803_vm11, %v2260_v47, %v2262_v23 }
 0x5fe   : > { %v2315_v46 = vsel %vm492_vm2, %v2287_v55, 0  ;;  %v2258_v56 = vpop.permute.xlu0 %2257 }
 0x5ff   : > { %2367 = vmatpush.bf16.msrb.mxu3 %v2315_v46  ;;  %v2281_v52 = vsel %vm803_vm11, %v2258_v56, %v2260_v47 }
 0x603   : > { %2368 = vmatpush.bf16.msrb.mxu3 %v2284_v14 }
 0x604   : > { %v2278_v1 = vpop.permute.xlu1 %2277  ;;  %v2300_v43 = vpop.permute.xlu2 %2299 }
 0x605   : > { %v2288_v34 = vsel %vm803_vm11, %v2276_v3, %v2278_v1  ;;  %v2289_v11 = vsel %vm803_vm11, %v2278_v1, %v2280_v16 }
 0x606   : > { %v2318_v37 = vsel %vm492_vm2, %v2288_v34, 0  ;;  %v2321_v24 = vsel %vm492_vm2, %v2289_v11, 0  ;;  %v2270_v2 = vpop.permute.xlu0 %2269  ;;  %vm2448_vm2 = vcmask 64512  }
 0x607   : > { %2369 = vmatpush.bf16.msrb.mxu3 %v2281_v52  ;;  %2380 = vmatpush.bf16.msra.mxu0 %v2318_v37  ;;  %v2285_v58 = vsel %vm803_vm11, %v2268_v9, %v2270_v2 }
 0x608   : > { %2393 = vmatpush.bf16.msra.mxu1 %v2321_v24 }
 0x60a   : > { %2555 = vmatmul.msk.bf16.vlgmr.msrb.gmra.mxu3 %vm883_vm12, %v1753_v54 }
 0x60b   : > { %2381 = vmatpush.bf16.msra.mxu0 %v2285_v58 }
 0x60c   : > { %v2272_v35 = vpop.permute.xlu1 %2271 }
 0x60d   : > { %v2286_v63 = vsel %vm803_vm11, %v2270_v2, %v2272_v35 }
 0x60e   : > { %2394 = vmatpush.bf16.msra.mxu1 %v2286_v63  ;;  %v2264_v36 = vpop.permute.xlu0 %2263 }
 0x60f   : > { %2382 = vmatpush.bf16.msra.mxu0 %v2282_v42  ;;  %v2283_v60 = vsel %vm803_vm11, %v2262_v23, %v2264_v36 }
 0x612   : > { %2556 = vmatmul.msk.bf16.vlgmr.msra.gmra.mxu0 %vm883_vm12, %v1753_v54  ;;  %2395 = vmatpush.bf16.msra.mxu1 %v2283_v60 }
 0x614   : > { %v871_v7 = vpop.permute.xlu1 %870 }
 0x615   : > { %2557 = vmatmul.msk.bf16.vlgmr.msra.gmra.mxu1 %vm883_vm12, %v1753_v54  ;;  %v957_v45 = vadd.f32 %v3179_v8, %v871_v7  ;;  %v971_v53 = vadd.f32 %v3181_v62, %v871_v7  ;;  %v985_v41 = vadd.f32 %v3184_v27, %v871_v7  ;;  %v915_v31 = vadd.f32 %v3070_v59, %v871_v7 }
 0x616   : > { %v929_v50 = vadd.f32 %v3072_v61, %v871_v7  ;;  %v943_v10 = vadd.f32 %v3074_v5, %v871_v7 }
 0x617   : > { %v992_v6 = vmax.f32 %v957_v45, 0.0  ;;  %v993_v32 = vmax.f32 %v971_v53, 0.0  ;;  %v994_v49 = vmax.f32 %v985_v41, 0.0  ;;  %v989_v15 = vmax.f32 %v915_v31, 0.0 }
 0x618   : > { %v990_v38 = vmax.f32 %v929_v50, 0.0  ;;  %v991_v48 = vmax.f32 %v943_v10, 0.0  ;;  %v2567_v50 = vld [vmem:[%s3896_s4] sm:$0x10] }
 0x619   : > { %v1017_v20 = vmul.f32 %v3189_v18, %v992_v6  ;;  %v1018_v8 = vmul.f32 %v3193_v4, %v993_v32  ;;  %v1014_v62 = vmul.f32 %v3086_v39, %v989_v15  ;;  %v1019_v59 = vmul.f32 %v3199_v0, %v994_v49 }
 0x61a   : > { %v1015_v27 = vmul.f32 %v3089_v40, %v990_v38  ;;  %v1016_v61 = vmul.f32 %v3095_v21, %v991_v48 }
 0x61b   : > { %v1030_v22 = vadd.f32 %v1018_v8, %v1017_v20 }
 0x61c   : > { %v1026_v5 = vadd.f32 %v1015_v27, %v1014_v62 }
 0x61d   : > { %v1031_v33 = vadd.f32 %v1030_v22, %v1019_v59 }
 0x61e   : > { %v1027_v12 = vadd.f32 %v1026_v5, %v1016_v61 }
 0x61f   : > { %1032 = vadd.xlane.f32.xlu1 %v1031_v33 }
 0x620   : > { %1028 = vadd.xlane.f32.xlu0 %v1027_v12 }
 0x62e   : > { %v2345_v26 = vpop.f32.mrf.mxu1 }
 0x62f   : > { %v2346_v28 = vadd.f32 %v2345_v26, %v2300_v43 }
 0x631   : > { %v2402_v17 = vmax.f32 %v2346_v28, 0.0 }
 0x633   : > { %v2408_v30 = vmul.f32 %v2402_v17, %v3089_v40 }
 0x634   : > { %2435 = vperm.xlu0 %2587, %v2431_v13  }
 0x636   : > { %v2347_v54 = vpop.f32.mrf.mxu1 }
 0x638   : > { %2440 = vperm.xlu1 %2588, %v2432_v44  }
 0x63b   : > { %v2332_v19 = vpop.f32.mrf.mxu0 }
 0x63c   : > { %v2333_v57 = vadd.f32 %v2332_v19, %v2300_v43 }
 0x63e   : > { %v2401_v9 = vmax.f32 %v2333_v57, 0.0 }
 0x640   : > { %v2407_v51 = vmul.f32 %v2401_v9, %v3086_v39 }
 0x642   : > { %v2413_v55 = vadd.f32 %v2408_v30, %v2407_v51 }
 0x643   : > { %v2334_v29 = vpop.f32.mrf.mxu0 }
 0x668   : > { %v2358_v25 = vpop.f32.mrf.mxu2 }
 0x669   : > { %v2359_v47 = vadd.f32 %v2358_v25, %v2300_v43 }
 0x66b   : > { %v2403_v3 = vmax.f32 %v2359_v47, 0.0 }
 0x66d   : > { %v2409_v46 = vmul.f32 %v2403_v3, %v3095_v21 }
 0x66f   : > { %v2414_v56 = vadd.f32 %v2413_v55, %v2409_v46 }
 0x670   : > { %v2360_v16 = vpop.f32.mrf.mxu2 }
 0x671   : > { %2415 = vadd.xlane.f32.xlu2 %v2414_v56 }
 0x68d   : > { %v2371_v14 = vpop.f32.mrf.mxu3 }
 0x68e   : > { %v2372_v1 = vadd.f32 %v2371_v14, %v2300_v43 }
 0x68f   : > { %v2384_v34 = vpop.f32.mrf.mxu0 }
 0x690   : > { %v2385_v11 = vadd.f32 %v2384_v34, %v2300_v43  ;;  %v2404_v37 = vmax.f32 %v2372_v1, 0.0 }
 0x692   : > { %v2405_v24 = vmax.f32 %v2385_v11, 0.0  ;;  %v2397_v52 = vpop.f32.mrf.mxu1  ;;  %v2410_v58 = vmul.f32 %v2404_v37, %v3189_v18  ;;  %v1033_v7 = vpop.xlane.xlu1 %1032 }
 0x693   : > { %v2398_v2 = vadd.f32 %v2397_v52, %v2300_v43  ;;  %v1029_v45 = vpop.xlane.xlu0 %1028 }
 0x694   : > { %v2411_v39 = vmul.f32 %v2405_v24, %v3193_v4  ;;  %v2422_v4 = vsel %vm2421_vm15, %v1029_v45, %v1033_v7 }
 0x695   : > { %v2373_v40 = vpop.f32.mrf.mxu3  ;;  %v2406_v23 = vmax.f32 %v2398_v2, 0.0 }
 0x696   : > { %v2417_v35 = vadd.f32 %v2411_v39, %v2410_v58 }
 0x697   : > { %v2412_v21 = vmul.f32 %v2406_v23, %v3199_v0  ;;  %v2386_v63 = vpop.f32.mrf.mxu0  ;;  %v2560_v0 = vld [vmem:[%s3896_s4] sm:$0xf] }
 0x698   : > { %v2561_v32 = vor.u32 %v2567_v50, %v2560_v0 }
 0x699   : > { %v2418_v42 = vadd.f32 %v2417_v35, %v2412_v21 }
 0x69a   : > { %v2399_v36 = vpop.f32.mrf.mxu1 }
 0x69b   : > { %2419 = vadd.xlane.f32.xlu2 %v2418_v42 }
 0x6a6   : > { %v2436_v49 = vpop.permute.xlu0 %2435 }
 0x6aa   : > { %v2441_v48 = vpop.permute.xlu1 %2440 }
 0x6e4   : > { %v2416_v60 = vpop.xlane.xlu2 %2415 }
 0x6e5   : > { %v2424_v53 = vsel %vm2423_vm0, %v2422_v4, %v2416_v60 }
 0x70e   : > { %v2420_v18 = vpop.xlane.xlu2 %2419 }
 0x70f   : > { %v2426_v41 = vsel %vm2425_vm1, %v2424_v53, %v2420_v18 }
 0x710   : > { %v2427_v31 = vmul.f32 0.00390625, %v2426_v41 }
 0x712   : > { %v2430_v10 = vpack.c.bf16 %v2427_v31, %v2427_v31 }
 0x714   : > { %v2453_v6 = vsel %vm501_vm4, %v2430_v10, 0 }
 0x715   : > { %2462 = vmatpush.bf16.msra.mxu2 %v2453_v6 }
 0x718   : > { %2562 = vmatmul.msk.bf16.vlgmr.msra.gmra.mxu2 %vm2448_vm2, %v2561_v32 }
 0x79b   : > { %v2464_v15 = vpop.f32.mrf.mxu2 }
 0x79c   : > { %v2465_v38 = vadd.f32 %v2464_v15, %v2436_v49 }
 0x79e   : > { %2470 = vst.msk [vmem:[%s307_s26] sm:$0xff] %vm2469_vm3, %v2465_v38 }
 0x7a3   : > { %v2466_v20 = vpop.f32.mrf.mxu2 }
 0x7a4   : > { %v2467_v8 = vadd.f32 %v2466_v20, %v2441_v48 }
 0x7a6   : > { %2472 = vst.msk [vmem:[%s307_s26 + $0x8] sm:$0x3] %vm2471_vm5, %v2467_v8 }
 0x7a7 PF: > { %s18_s27 = sadd.s32 1, %s2611_s27  }
 0x7a8   : > { %p15_p5 = scmp.ge.s32.totalorder %s18_s27, 4  }
 0x7aa   :  { %17 = sbr.rel (!%p15_p5) target bundleno = 1 (0x1), region = 108 }

</bundles_post_ra>
